<compile_context>
chip_gen: v5e
topology: v5e:2x2
jax: 0.10.0
libtpu: 0.0.40
codegen_flags: <defaults>
</compile_context>

<pallas_src>
import jax
import jax.numpy as jnp
from jax.experimental import pallas as pl
from jax.experimental.pallas import tpu as pltpu

EPS = 1e-5
NEG_SLOPE = 0.2
LANE = 128
ROW_PAD = 256           # node-count padding granularity
TILE_K = 512            # aggregation / pooling contraction tile


def _round_up(v, m):
    return (v + m - 1) // m * m


def _pick_row_tile(n_pad):
    # Prefer 512-row tiles, but keep >= 2 row blocks so the "parallel" axis can
    # shard across v7x's two TensorCores.
    for t in (512, 256):
        if n_pad % t == 0 and n_pad // t >= 2:
            return t
    return min(512, n_pad)


# ---------------------------------------------------------------------------
# Kernel 1: one fused SAGE layer, tiled over node rows (i, "parallel") and the
#           aggregation contraction (k, "arbitrary").
#
#   acc_i  += A[i,k] @ X[k]                      (int8 0/1 tile -> bf16, f32 acc)
#   agg_i   = acc_i * inv_deg_i                  (f32 mean normalization)
#   h_i     = agg_i @ W_l + X_i @ W_r + b        (BN folded into W_l/W_r/b)
#   out_i   = leaky_relu(h_i, 0.2)               (dropout = identity, eval)
# ---------------------------------------------------------------------------
def sage_layer_kernel(a_ref, xk_ref, xi_ref, idg_ref, wl_ref, wr_ref, b_ref,
                      o_ref, acc_ref):
    k = pl.program_id(1)

    @pl.when(k == 0)
    def _init():
        acc_ref[...] = jnp.zeros_like(acc_ref)

    # 0/1 adjacency stored int8 in HBM; upcast the tile to bf16 for the MXU.
    a = a_ref[...].astype(jnp.bfloat16)
    acc_ref[...] += jnp.dot(a, xk_ref[...], preferred_element_type=jnp.float32)

    @pl.when(k == pl.num_programs(1) - 1)
    def _finish():
        # mean aggregation: f32 accumulator scaled by f32 1/deg (never bf16)
        agg = (acc_ref[...] * idg_ref[...]).astype(jnp.bfloat16)
        # two dots summed (no (tm, 2F) concat buffer / relayout)
        h = jnp.dot(agg, wl_ref[...], preferred_element_type=jnp.float32)
        h = h + jnp.dot(xi_ref[...], wr_ref[...],
                        preferred_element_type=jnp.float32)
        h = h + b_ref[...]
        o_ref[...] = jnp.where(h > 0, h, NEG_SLOPE * h).astype(o_ref.dtype)


def sage_layer(adj_i8, x, inv_deg, w_l, w_r, b_fold):
    """adj_i8: (Np,Np) int8, x: (Np,F) bf16, inv_deg: (Np,1) f32,
    w_l/w_r: (F,H) bf16, b_fold: (1,H) f32."""
    n, f = x.shape
    h = w_l.shape[1]
    tm = _pick_row_tile(n)
    tk = min(TILE_K, n)
    grid = (n // tm, n // tk)
    return pl.pallas_call(
        sage_layer_kernel,
        out_shape=jax.ShapeDtypeStruct((n, h), jnp.bfloat16),
        grid_spec=pltpu.PrefetchScalarGridSpec(
            num_scalar_prefetch=0,
            grid=grid,
            in_specs=[
                pl.BlockSpec((tm, tk), lambda i, k: (i, k)),      # A (int8 0/1)
                pl.BlockSpec((tk, f), lambda i, k: (k, 0)),       # X (contraction rows)
                pl.BlockSpec((tm, f), lambda i, k: (i, 0)),       # X (self rows)
                pl.BlockSpec((tm, 1), lambda i, k: (i, 0)),       # 1/deg (f32)
                pl.BlockSpec((f, h), lambda i, k: (0, 0)),        # W_l (BN folded)
                pl.BlockSpec((f, h), lambda i, k: (0, 0)),        # W_r (BN folded)
                pl.BlockSpec((1, h), lambda i, k: (0, 0)),        # bias (BN folded)
            ],
            out_specs=pl.BlockSpec((tm, h), lambda i, k: (i, 0)),
            scratch_shapes=[pltpu.VMEM((tm, f), jnp.float32)],
        ),
        compiler_params=pltpu.CompilerParams(
            dimension_semantics=("parallel", "arbitrary"),
            vmem_limit_bytes=48 * 1024 * 1024,
        ),
    )(adj_i8, x, x, inv_deg, w_l, w_r, b_fold)


# ---------------------------------------------------------------------------
# Kernel 2: global_add_pool + (folded BN) + Linear head, tiled over the node
#           contraction.  Pooled sums stay f32 through the head matmul.
#   acc += P[:,k] @ X[k] ;  out = acc @ W_fc' + b_fc'
# ---------------------------------------------------------------------------
def pool_head_kernel(p_ref, x_ref, wf_ref, bf_ref, o_ref, acc_ref):
    k = pl.program_id(0)

    @pl.when(k == 0)
    def _init():
        acc_ref[...] = jnp.zeros_like(acc_ref)

    acc_ref[...] += jnp.dot(p_ref[...], x_ref[...],
                            preferred_element_type=jnp.float32)

    @pl.when(k == pl.num_programs(0) - 1)
    def _finish():
        o_ref[...] = (jnp.dot(acc_ref[...], wf_ref[...],
                              preferred_element_type=jnp.float32) + bf_ref[...])


def pool_head(pool_mat, x, w_fc, b_fc):
    g = pool_mat.shape[0]
    n, hdim = x.shape
    latent = w_fc.shape[1]
    tk = min(TILE_K, n)
    grid = (n // tk,)
    return pl.pallas_call(
        pool_head_kernel,
        out_shape=jax.ShapeDtypeStruct((g, latent), jnp.float32),
        grid_spec=pltpu.PrefetchScalarGridSpec(
            num_scalar_prefetch=0,
            grid=grid,
            in_specs=[
                pl.BlockSpec((g, tk), lambda k: (0, k)),          # pool one-hot
                pl.BlockSpec((tk, hdim), lambda k: (k, 0)),       # activations
                pl.BlockSpec((hdim, latent), lambda k: (0, 0)),   # W_fc (f32)
                pl.BlockSpec((1, latent), lambda k: (0, 0)),      # b_fc (f32)
            ],
            out_specs=pl.BlockSpec((g, latent), lambda k: (0, 0)),
            scratch_shapes=[pltpu.VMEM((g, hdim), jnp.float32)],
        ),
        compiler_params=pltpu.CompilerParams(
            dimension_semantics=("arbitrary",),
            vmem_limit_bytes=48 * 1024 * 1024,
        ),
    )(pool_mat, x, w_fc, b_fc)


# ---------------------------------------------------------------------------
# Wrapper: BN folding, lane-dense padding, int8 adjacency / pooling matrices
# ---------------------------------------------------------------------------
def prepare_params(params, input_dim, hidden_dim, latent_dim):
    f_pad0 = _round_up(input_dim, LANE)
    h_pad = _round_up(hidden_dim, LANE)
    l_pad = _round_up(latent_dim, LANE)
    layer_params = []
    for i, lyr in enumerate(params["layers"]):
        f_in = lyr["w_l"].shape[0]
        f_in_pad = f_pad0 if i == 0 else h_pad
        # fold eval-mode BN into the SAGEConv linears
        scale = lyr["bn_gamma"] * jax.lax.rsqrt(lyr["bn_var"] + EPS)
        w_l = lyr["w_l"] * scale[None, :]
        w_r = lyr["w_r"] * scale[None, :]
        b = (lyr["b_l"] - lyr["bn_mean"]) * scale + lyr["bn_beta"]
        # lane-dense zero padding, bf16 for the MXU
        w_l_p = (jnp.zeros((f_in_pad, h_pad), jnp.float32)
                 .at[:f_in, :hidden_dim].set(w_l).astype(jnp.bfloat16))
        w_r_p = (jnp.zeros((f_in_pad, h_pad), jnp.float32)
                 .at[:f_in, :hidden_dim].set(w_r).astype(jnp.bfloat16))
        b_p = jnp.zeros((1, h_pad), jnp.float32).at[0, :hidden_dim].set(b)
        layer_params.append((w_l_p, w_r_p, b_p))
    # head: BN_eval(pooled) @ W_fc + b_fc  ->  pooled @ W' + b'   (kept in f32)
    hd = params["head"]
    scale = hd["bn_gamma"] * jax.lax.rsqrt(hd["bn_var"] + EPS)
    shift = hd["bn_beta"] - hd["bn_mean"] * scale
    w_fc = hd["w_fc"] * scale[:, None]
    b_fc = hd["b_fc"] + shift @ hd["w_fc"]
    w_fc_p = (jnp.zeros((h_pad, l_pad), jnp.float32)
              .at[:hidden_dim, :latent_dim].set(w_fc))
    b_fc_p = jnp.zeros((1, l_pad), jnp.float32).at[0, :latent_dim].set(b_fc)
    return layer_params, (w_fc_p, b_fc_p), (f_pad0, h_pad, l_pad)


def sage_forward(params, x, edge_index, batch, num_graphs):
    n, f_in = x.shape
    hidden_dim = params["layers"][0]["w_l"].shape[1]
    latent_dim = params["head"]["w_fc"].shape[1]

    layer_params, (w_fc, b_fc), (f_pad, h_pad, l_pad) = prepare_params(
        params, f_in, hidden_dim, latent_dim)

    n_pad = _round_up(max(n, ROW_PAD), ROW_PAD)
    g_pad = _round_up(max(num_graphs, 16), 16)

    src, dst = edge_index[0], edge_index[1]
    # 0/1 (multi-)edge-count adjacency scattered straight into int8 storage:
    # a single N^2 HBM pass (no f32 intermediate, no divide pass, no cast pass).
    adj_i8 = jnp.zeros((n_pad, n_pad), jnp.int8).at[dst, src].add(1)
    # in-degree from the edge list (O(E)); 1/deg stays f32 for the kernel
    deg = jnp.zeros((n_pad,), jnp.float32).at[dst].add(1.0)
    inv_deg = (1.0 / jnp.maximum(deg, 1.0)).reshape(n_pad, 1)

    # one-hot pooling matrix (G_pad, N_pad): global_add_pool as a matmul.
    # Padded nodes get graph id -1, so they never contribute to a pooled row.
    batch_full = jnp.full((n_pad,), -1, jnp.int32).at[:n].set(batch)
    pool_mat = (jnp.arange(g_pad)[:, None] == batch_full[None, :]).astype(jnp.bfloat16)

    # NOTE: padded node rows DO acquire nonzero activations after layer 1
    # (leaky_relu of the folded bias), but they are fully isolated: adjacency
    # columns and pool_mat columns for padded nodes are all zero, so they never
    # feed real-node results.  Preserve that invariant if padding changes.
    h = (jnp.zeros((n_pad, f_pad), jnp.float32)
         .at[:n, :f_in].set(x).astype(jnp.bfloat16))

    for (w_l, w_r, b_p) in layer_params:
        h = sage_layer(adj_i8, h, inv_deg, w_l, w_r, b_p)

    out = pool_head(pool_mat, h, w_fc, b_fc)
    return out[:num_graphs, :latent_dim]


# ---------------------------------------------------------------------------
# Pure-JAX reference (unfolded, f32) for validation
# ---------------------------------------------------------------------------
def sage_reference(params, x, edge_index, batch, num_graphs):
    n = x.shape[0]
    src, dst = edge_index[0], edge_index[1]
    adj = jnp.zeros((n, n), jnp.float32).at[dst, src].add(1.0)
    deg = jnp.maximum(adj.sum(axis=1, keepdims=True), 1.0)
    a_norm = adj / deg
    h = x
    for lyr in params["layers"]:
        agg = a_norm @ h
        z = agg @ lyr["w_l"] + lyr["b_l"] + h @ lyr["w_r"]
        z = ((z - lyr["bn_mean"]) * jax.lax.rsqrt(lyr["bn_var"] + EPS)
             * lyr["bn_gamma"] + lyr["bn_beta"])
        h = jnp.where(z > 0, z, NEG_SLOPE * z)
    pool = (jnp.arange(num_graphs)[:, None] == batch[None, :]).astype(jnp.float32)
    pooled = pool @ h
    hd = params["head"]
    pooled = ((pooled - hd["bn_mean"]) * jax.lax.rsqrt(hd["bn_var"] + EPS)
              * hd["bn_gamma"] + hd["bn_beta"])
    return pooled @ hd["w_fc"] + hd["b_fc"]


# ---------------------------------------------------------------------------
# Deterministic parameter construction (PyTorch-layout params, eval-mode BN)
# ---------------------------------------------------------------------------
def init_params(key, input_dim, hidden_dim, latent_dim, n_layers):
    params = {"layers": []}
    for i in range(n_layers):
        f_in = input_dim if i == 0 else hidden_dim
        key, k1, k2, k3, k4, k5, k6, k7 = jax.random.split(key, 8)
        scale = 1.0 / jnp.sqrt(jnp.float32(f_in))
        params["layers"].append({
            # stored as (F_in, H) so the kernel does X @ W directly
            "w_l": jax.random.uniform(k1, (f_in, hidden_dim), jnp.float32, -scale, scale),
            "b_l": jax.random.uniform(k2, (hidden_dim,), jnp.float32, -scale, scale),
            "w_r": jax.random.uniform(k3, (f_in, hidden_dim), jnp.float32, -scale, scale),
            "bn_gamma": jax.random.uniform(k4, (hidden_dim,), jnp.float32, 0.5, 1.5),
            "bn_beta": jax.random.uniform(k5, (hidden_dim,), jnp.float32, -0.2, 0.2),
            "bn_mean": jax.random.uniform(k6, (hidden_dim,), jnp.float32, -0.5, 0.5),
            "bn_var": jax.random.uniform(k7, (hidden_dim,), jnp.float32, 0.5, 1.5),
        })
    key, k1, k2, k3, k4, k5, k6 = jax.random.split(key, 7)
    scale = 1.0 / jnp.sqrt(jnp.float32(hidden_dim))
    params["head"] = {
        "bn_gamma": jax.random.uniform(k3, (hidden_dim,), jnp.float32, 0.5, 1.5),
        "bn_beta": jax.random.uniform(k4, (hidden_dim,), jnp.float32, -0.2, 0.2),
        "bn_mean": jax.random.uniform(k5, (hidden_dim,), jnp.float32, -0.5, 0.5),
        "bn_var": jax.random.uniform(k6, (hidden_dim,), jnp.float32, 0.5, 1.5),
        "w_fc": jax.random.uniform(k1, (hidden_dim, latent_dim), jnp.float32, -scale, scale),
        "b_fc": jax.random.uniform(k2, (latent_dim,), jnp.float32, -scale, scale),
    }
    return params


if __name__ == "__main__":
    # small synthetic graph batch: 2 graphs, 16 nodes total, 8 input features
    N_NODES, N_EDGES, N_GRAPHS = 16, 40, 2
    INPUT_DIM, HIDDEN_DIM, LATENT_DIM, N_LAYERS = 8, 32, 16, 2

    key = jax.random.PRNGKey(0)
    key, kx, ks, kd = jax.random.split(key, 4)

    x = jax.random.normal(kx, (N_NODES, INPUT_DIM), jnp.float32)
    src = jax.random.randint(ks, (N_EDGES,), 0, N_NODES)
    dst = jax.random.randint(kd, (N_EDGES,), 0, N_NODES)
    edge_index = jnp.stack([src, dst], axis=0)                       # (2, E)
    batch = (jnp.arange(N_NODES) >= N_NODES // 2).astype(jnp.int32)  # (N,) graph id

    params = init_params(key, INPUT_DIM, HIDDEN_DIM, LATENT_DIM, N_LAYERS)

    out = sage_forward(params, x, edge_index, batch, N_GRAPHS)
    out = jax.block_until_ready(out)
    assert out.shape == (N_GRAPHS, LATENT_DIM)
    assert bool(jnp.all(jnp.isfinite(out)))

    # validate against full-precision reference (bf16 X / weights on the MXU,
    # but exact int8 adjacency + f32 1/deg + f32 pooled sums -> tighter tol)
    ref = sage_reference(params, x, edge_index, batch, N_GRAPHS)
    err = float(jnp.max(jnp.abs(out - ref)))
    ref_scale = float(jnp.max(jnp.abs(ref)))
    assert err <= 0.04 * ref_scale + 0.04, f"max abs err {err} (ref scale {ref_scale})"

    print("KERNEL_OK")
</pallas_src>

<mosaic_0001>
module attributes {stable_mosaic.version = 11 : i64} {
  func.func @sage_layer_kernel(%arg0: i32, %arg1: i32, %arg2: memref<256x256xi8, #tpu.memory_space<vmem>>, %arg3: memref<256x128xbf16, #tpu.memory_space<vmem>>, %arg4: memref<256x128xbf16, #tpu.memory_space<vmem>>, %arg5: memref<256x1xf32, #tpu.memory_space<vmem>>, %arg6: memref<128x128xbf16, #tpu.memory_space<vmem>>, %arg7: memref<128x128xbf16, #tpu.memory_space<vmem>>, %arg8: memref<1x128xf32, #tpu.memory_space<vmem>>, %arg9: memref<256x128xbf16, #tpu.memory_space<vmem>>, %arg10: memref<256x128xf32, #tpu.memory_space<vmem>>) attributes {dimension_semantics = [#tpu.dimension_semantics<parallel>, #tpu.dimension_semantics<arbitrary>], iteration_bounds = array<i64: 1, 1>, scalar_prefetch = 0 : i64, scratch_operands = 1 : i64, tpu.core_type = #tpu.core_type<tc>, window_params = [{transform_indices = @transform_0, window_bounds = array<i64: 256, 256>}, {transform_indices = @transform_1, window_bounds = array<i64: 256, 128>}, {transform_indices = @transform_2, window_bounds = array<i64: 256, 128>}, {transform_indices = @transform_3, window_bounds = array<i64: 256, 1>}, {pipeline_mode = #tpu.pipeline_mode<synchronous>, transform_indices = @transform_4, window_bounds = array<i64: 128, 128>}, {pipeline_mode = #tpu.pipeline_mode<synchronous>, transform_indices = @transform_5, window_bounds = array<i64: 128, 128>}, {pipeline_mode = #tpu.pipeline_mode<synchronous>, transform_indices = @transform_6, window_bounds = array<i64: 1, 128>}, {transform_indices = @transform_7, window_bounds = array<i64: 256, 128>}]} {
    %c0_i32 = arith.constant 0 : i32
    %0 = arith.cmpi eq, %arg1, %c0_i32 : i32
    %1 = arith.extui %0 : i1 to i32
    %c0_i32_0 = arith.constant 0 : i32
    %2 = arith.cmpi ne, %1, %c0_i32_0 : i32
    scf.if %2 {
      %cst_10 = arith.constant 0.000000e+00 : f32
      %13 = vector.broadcast %cst_10 : f32 to vector<256x128xf32>
      %c0_11 = arith.constant 0 : index
      %c0_12 = arith.constant 0 : index
      %14 = vector.load %arg10[%c0_11, %c0_12] : memref<256x128xf32, #tpu.memory_space<vmem>>, vector<256x128xf32>
      tpu.vector_store %arg10[%c0_11, %c0_12], %13 {strides = array<i32>} : memref<256x128xf32, #tpu.memory_space<vmem>>, vector<256x128xf32>,
    } else {
    }
    %c0 = arith.constant 0 : index
    %c0_1 = arith.constant 0 : index
    %3 = vector.load %arg2[%c0, %c0_1] : memref<256x256xi8, #tpu.memory_space<vmem>>, vector<256x256xi8>
    %4 = arith.sitofp %3 : vector<256x256xi8> to vector<256x256xbf16>
    %c0_2 = arith.constant 0 : index
    %c0_3 = arith.constant 0 : index
    %5 = vector.load %arg10[%c0_2, %c0_3] : memref<256x128xf32, #tpu.memory_space<vmem>>, vector<256x128xf32>
    %c0_4 = arith.constant 0 : index
    %c0_5 = arith.constant 0 : index
    %6 = vector.load %arg3[%c0_4, %c0_5] : memref<256x128xbf16, #tpu.memory_space<vmem>>, vector<256x128xbf16>
    %cst = arith.constant dense<0.000000e+00> : vector<256x128xf32>
    %7 = tpu.matmul %4, %6, %cst {dimension_numbers = #tpu.dot_dimension_numbers<[1], [0], [0], [1], [0, 0, 1, 1], [], []>} : vector<256x256xbf16>, vector<256x128xbf16>, vector<256x128xf32> -> vector<256x128xf32>
    %8 = arith.addf %5, %7 : vector<256x128xf32>
    %c0_6 = arith.constant 0 : index
    %c0_7 = arith.constant 0 : index
    %9 = vector.load %arg10[%c0_6, %c0_7] : memref<256x128xf32, #tpu.memory_space<vmem>>, vector<256x128xf32>
    tpu.vector_store %arg10[%c0_6, %c0_7], %8 {strides = array<i32>} : memref<256x128xf32, #tpu.memory_space<vmem>>, vector<256x128xf32>,
    %c0_i32_8 = arith.constant 0 : i32
    %10 = arith.cmpi eq, %arg1, %c0_i32_8 : i32
    %11 = arith.extui %10 : i1 to i32
    %c0_i32_9 = arith.constant 0 : i32
    %12 = arith.cmpi ne, %11, %c0_i32_9 : i32
    scf.if %12 {
      %c0_10 = arith.constant 0 : index
      %c0_11 = arith.constant 0 : index
      %13 = vector.load %arg10[%c0_10, %c0_11] : memref<256x128xf32, #tpu.memory_space<vmem>>, vector<256x128xf32>
      %c0_12 = arith.constant 0 : index
      %c0_13 = arith.constant 0 : index
      %14 = vector.load %arg5[%c0_12, %c0_13] : memref<256x1xf32, #tpu.memory_space<vmem>>, vector<256x1xf32>
      %15 = vector.broadcast %14 : vector<256x1xf32> to vector<256x128xf32>
      %16 = arith.mulf %13, %15 : vector<256x128xf32>
      %17 = arith.truncf %16 : vector<256x128xf32> to vector<256x128xbf16>
      %c0_14 = arith.constant 0 : index
      %c0_15 = arith.constant 0 : index
      %18 = vector.load %arg6[%c0_14, %c0_15] : memref<128x128xbf16, #tpu.memory_space<vmem>>, vector<128x128xbf16>
      %cst_16 = arith.constant dense<0.000000e+00> : vector<256x128xf32>
      %19 = tpu.matmul %17, %18, %cst_16 {dimension_numbers = #tpu.dot_dimension_numbers<[1], [0], [0], [1], [0, 0, 1, 1], [], []>} : vector<256x128xbf16>, vector<128x128xbf16>, vector<256x128xf32> -> vector<256x128xf32>
      %c0_17 = arith.constant 0 : index
      %c0_18 = arith.constant 0 : index
      %20 = vector.load %arg4[%c0_17, %c0_18] : memref<256x128xbf16, #tpu.memory_space<vmem>>, vector<256x128xbf16>
      %c0_19 = arith.constant 0 : index
      %c0_20 = arith.constant 0 : index
      %21 = vector.load %arg7[%c0_19, %c0_20] : memref<128x128xbf16, #tpu.memory_space<vmem>>, vector<128x128xbf16>
      %cst_21 = arith.constant dense<0.000000e+00> : vector<256x128xf32>
      %22 = tpu.matmul %20, %21, %cst_21 {dimension_numbers = #tpu.dot_dimension_numbers<[1], [0], [0], [1], [0, 0, 1, 1], [], []>} : vector<256x128xbf16>, vector<128x128xbf16>, vector<256x128xf32> -> vector<256x128xf32>
      %23 = arith.addf %19, %22 : vector<256x128xf32>
      %c0_22 = arith.constant 0 : index
      %c0_23 = arith.constant 0 : index
      %24 = vector.load %arg8[%c0_22, %c0_23] : memref<1x128xf32, #tpu.memory_space<vmem>>, vector<1x128xf32>
      %25 = vector.broadcast %24 : vector<1x128xf32> to vector<256x128xf32>
      %26 = arith.addf %23, %25 : vector<256x128xf32>
      %cst_24 = arith.constant 0.000000e+00 : f32
      %27 = vector.broadcast %cst_24 : f32 to vector<256x128xf32>
      %28 = arith.cmpf ogt, %26, %27 : vector<256x128xf32>
      %cst_25 = arith.constant 2.000000e-01 : f32
      %29 = vector.broadcast %cst_25 : f32 to vector<256x128xf32>
      %30 = arith.mulf %29, %26 : vector<256x128xf32>
      %31 = arith.select %28, %26, %30 : vector<256x128xi1>, vector<256x128xf32>
      %32 = arith.truncf %31 : vector<256x128xf32> to vector<256x128xbf16>
      %c0_26 = arith.constant 0 : index
      %c0_27 = arith.constant 0 : index
      %33 = vector.load %arg9[%c0_26, %c0_27] : memref<256x128xbf16, #tpu.memory_space<vmem>>, vector<256x128xbf16>
      tpu.vector_store %arg9[%c0_26, %c0_27], %32 {strides = array<i32>} : memref<256x128xbf16, #tpu.memory_space<vmem>>, vector<256x128xbf16>,
    } else {
    }
    return
  }
  func.func @transform_0(%arg0: i32, %arg1: i32) -> (i32, i32) {
    %c0_i32 = arith.constant 0 : i32
    return %arg0, %arg1 : i32, i32
  }
  func.func @transform_1(%arg0: i32, %arg1: i32) -> (i32, i32) {
    %c0_i32 = arith.constant 0 : i32
    %c0_i32_0 = arith.constant 0 : i32
    return %arg1, %c0_i32 : i32, i32
  }
  func.func @transform_2(%arg0: i32, %arg1: i32) -> (i32, i32) {
    %c0_i32 = arith.constant 0 : i32
    %c0_i32_0 = arith.constant 0 : i32
    return %arg0, %c0_i32 : i32, i32
  }
  func.func @transform_3(%arg0: i32, %arg1: i32) -> (i32, i32) {
    %c0_i32 = arith.constant 0 : i32
    %c0_i32_0 = arith.constant 0 : i32
    return %arg0, %c0_i32 : i32, i32
  }
  func.func @transform_4(%arg0: i32, %arg1: i32) -> (i32, i32) {
    %c0_i32 = arith.constant 0 : i32
    %c0_i32_0 = arith.constant 0 : i32
    %c0_i32_1 = arith.constant 0 : i32
    return %c0_i32, %c0_i32_0 : i32, i32
  }
  func.func @transform_5(%arg0: i32, %arg1: i32) -> (i32, i32) {
    %c0_i32 = arith.constant 0 : i32
    %c0_i32_0 = arith.constant 0 : i32
    %c0_i32_1 = arith.constant 0 : i32
    return %c0_i32, %c0_i32_0 : i32, i32
  }
  func.func @transform_6(%arg0: i32, %arg1: i32) -> (i32, i32) {
    %c0_i32 = arith.constant 0 : i32
    %c0_i32_0 = arith.constant 0 : i32
    %c0_i32_1 = arith.constant 0 : i32
    return %c0_i32, %c0_i32_0 : i32, i32
  }
  func.func @transform_7(%arg0: i32, %arg1: i32) -> (i32, i32) {
    %c0_i32 = arith.constant 0 : i32
    %c0_i32_0 = arith.constant 0 : i32
    return %arg0, %c0_i32 : i32, i32
  }
}

</mosaic_0001>

<bundles_post_ra>
// kernel: tpu_custom_call.1
= control target key start
LH: loop header
LB: loop body
LE: loop exit
PB: predicated region body
PF: predicated region fallthrough
CT: control target
= control target key end

     0   :  { %12 = vsyncpa [#allocation4], 0  ;;  %s2394_s0 = inlined_call_operand.vmem [shape: s8[256,256], index: 0, kind: input, shape index: {}]   ;;  %s2395_s1 = inlined_call_operand.vmem [shape: bf16[256,128], index: 1, kind: input, shape index: {}]   ;;  %s2396_s2 = inlined_call_operand.hbm [shape: bf16[256,128], index: 2, kind: input, shape index: {}]   ;;  %s2397_s3 = inlined_call_operand.vmem [shape: f32[256,1], index: 3, kind: input, shape index: {}]   ;;  %s2398_s4 = inlined_call_operand.hbm [shape: bf16[128,128], index: 4, kind: input, shape index: {}]   ;;  %s2399_s5 = inlined_call_operand.hbm [shape: bf16[128,128], index: 5, kind: input, shape index: {}]   ;;  %s2400_s6 = inlined_call_operand.vmem [shape: f32[1,128], index: 6, kind: input, shape index: {}]   ;;  %s2401_s7 = inlined_call_operand.hbm [shape: bf16[256,128], index: 7, kind: output, shape index: {}]  }
   0x1   :  { %13 = vsyncpa [#allocation7], 0 }
   0x2   :  { %14 = vsyncpa [#allocation5], 0  ;;  %s38_s26 = sshll.u32 %s2398_s4, 4  ;;  %s2061_s27 = smov [#allocation6]   ;;  %s39_s26 = int_to_ptr.hbm [resolvable:$true] %s38_s26 }
   0x3   :  { %s40_s28 = sshll.u32 %s2061_s27, 4  ;;  %s23_s8 = sshll.u32 %s2396_s2, 4  ;;  %s41_s28 = int_to_ptr.vmem [resolvable:$true] %s40_s28  ;;  %s24_s8 = int_to_ptr.hbm [resolvable:$true] %s23_s8 }
   0x4   :  { %s2062_s9 = smov 64   ;;  %s2063_s10 = smov 4  }
   0x5   :  { %46 = dma.hbm_to_vmem [thread:$0]  %s39_s26, 1024, %s41_s28, [#allocation7], %s2062_s9, %s2062_s9, %s2063_s10  }
   0x6   :  { %s2064_s11 = smov [#allocation3]   ;;  %s51_s4 = sshll.u32 %s2399_s5, 4  ;;  %s52_s4 = int_to_ptr.hbm [resolvable:$true] %s51_s4 }
   0x7   :  { %s25_s12 = sshll.u32 %s2064_s11, 4  ;;  %s2065_s2 = smov [#allocation8]   ;;  %s26_s12 = int_to_ptr.vmem [resolvable:$true] %s25_s12 }
   0x8   :  { %31 = dma.hbm_to_vmem [thread:$0]  %s24_s8, 2048, %s26_s12, [#allocation4], %s2062_s9, %s2062_s9, %s2063_s10  }
   0x9   :  { %s53_s15 = sshll.u32 %s2065_s2, 4  ;;  %s54_s15 = int_to_ptr.vmem [resolvable:$true] %s53_s15 }
   0xa   :  { %59 = dma.hbm_to_vmem [thread:$0]  %s52_s4, 1024, %s54_s15, [#allocation7], %s2062_s9, %s2062_s9, %s2063_s10  }
   0xb   :  { %2055 = dma.done.wait [#allocation4], 2048  }
   0xc   :  { %2056 = vsyncadd [#allocation4], 4294965248 }
   0xd   :  { %2057 = dma.done.wait [#allocation7], 2048  }
   0xe   :  { %2058 = vsyncadd [#allocation7], 4294965248  ;;  %v2066_v0 = vmov 0   ;;  %v725_v1 = vld [vmem:[%s2397_s3 + $0x10] sm:$0xff]  ;;  %v723_v2 = vld [vmem:[%s2397_s3] sm:$0xff]  ;;  %s1599_s23 = sshll.u32 %s2401_s7, 4  ;;  %s1600_s23 = int_to_ptr.hbm [resolvable:$true] %s1599_s23 }
   0xf   :  { %1956 = vset.pattern.permute.xlu1 %v2066_v0  ;;  %1955 = vset.pattern.permute.xlu0 %v2066_v0  ;;  %v1812_v3 = vld [vmem:[%s2395_s1 + $0x38] sm:$0xff]  ;;  %v1811_v5 = vld [vmem:[%s2395_s1 + $0x30] sm:$0xff]  ;;  %v724_v8 = vld [vmem:[%s2397_s3 + $0x8] sm:$0xff] }
  0x10   :  { %1957 = vset.pattern.permute.xlu2 %v2066_v0  ;;  %767 = vperm.xlu1 %1956, %v725_v1   ;;  %v1820_v4 = vld [vmem:[%s2395_s1 + $0x78] sm:$0xff]  ;;  %v1819_v6 = vld [vmem:[%s2395_s1 + $0x70] sm:$0xff]  ;;  %v1810_v9 = vld [vmem:[%s2395_s1 + $0x28] sm:$0xff] }
  0x11   :  { %757 = vperm.xlu0 %1955, %v723_v2   ;;  %446 = vmatpush.bf16.msra.mxu0 %v1812_v3  ;;  %v726_v7 = vld [vmem:[%s2397_s3 + $0x18] sm:$0xff]  ;;  %v1818_v10 = vld [vmem:[%s2395_s1 + $0x68] sm:$0xff]  ;;  %v727_v11 = vld [vmem:[%s2397_s3 + $0x20] sm:$0xff] }
  0x12   :  { %535 = vmatpush.bf16.msra.mxu1 %v1820_v4  ;;  %777 = vperm.xlu2 %1957, %v727_v11   ;;  %v1809_v12 = vld [vmem:[%s2395_s1 + $0x20] sm:$0xff]  ;;  %v728_v14 = vld [vmem:[%s2397_s3 + $0x28] sm:$0xff]  ;;  %v730_v15 = vld [vmem:[%s2397_s3 + $0x38] sm:$0xff] }
  0x13   :  { %v1817_v13 = vld [vmem:[%s2395_s1 + $0x60] sm:$0xff]  ;;  %v729_v16 = vld [vmem:[%s2397_s3 + $0x30] sm:$0xff]  ;;  %v1808_v17 = vld [vmem:[%s2395_s1 + $0x18] sm:$0xff] }
  0x14   :  { %v1816_v18 = vld [vmem:[%s2395_s1 + $0x58] sm:$0xff]  ;;  %v1807_v19 = vld [vmem:[%s2395_s1 + $0x10] sm:$0xff]  ;;  %v110_v21 = vld [vmem:[%s2394_s0] sm:$0xff] }
  0x15   :  { %447 = vmatpush.bf16.msra.mxu0 %v1811_v5  ;;  %v1815_v20 = vld [vmem:[%s2395_s1 + $0x50] sm:$0xff]  ;;  %v111_v22 = vld [vmem:[%s2394_s0 + $0x8] sm:$0xff]  ;;  %v731_v23 = vld [vmem:[%s2397_s3 + $0x40] sm:$0xff]  ;;  %v126_v27 = vunpack.c.0.s8 %v110_v21  ;;  %v128_v28 = vunpack.c.1.s8 %v110_v21  ;;  %v130_v46 = vunpack.c.2.s8 %v110_v21  ;;  %v132_v47 = vunpack.c.3.s8 %v110_v21 }
  0x16   :  { %536 = vmatpush.bf16.msra.mxu1 %v1819_v6  ;;  %v733_v24 = vld [vmem:[%s2397_s3 + $0x50] sm:$0xff]  ;;  %v732_v25 = vld [vmem:[%s2397_s3 + $0x48] sm:$0xff]  ;;  %v127_v29 = vunpack.c.0.s8 %v111_v22  ;;  %v129_v30 = vunpack.c.1.s8 %v111_v22  ;;  %v1805_v32 = vld [vmem:[%s2395_s1] sm:$0xff]  ;;  %v131_v48 = vunpack.c.2.s8 %v111_v22  ;;  %v133_v49 = vunpack.c.3.s8 %v111_v22 }
  0x17   :  { %v1806_v26 = vld [vmem:[%s2395_s1 + $0x8] sm:$0xff]  ;;  %v190_v33 = vcvt.s32.f32 %v126_v27  ;;  %v192_v34 = vcvt.s32.f32 %v128_v28  ;;  %v1813_v37 = vld [vmem:[%s2395_s1 + $0x40] sm:$0xff]  ;;  %v734_v38 = vld [vmem:[%s2397_s3 + $0x58] sm:$0xff]  ;;  %v194_v50 = vcvt.s32.f32 %v130_v46  ;;  %v196_v51 = vcvt.s32.f32 %v132_v47 }
  0x18   :  { %772 = vperm.xlu1 %1956, %v726_v7   ;;  %v1814_v31 = vld [vmem:[%s2395_s1 + $0x48] sm:$0xff]  ;;  %v191_v35 = vcvt.s32.f32 %v127_v29  ;;  %v193_v36 = vcvt.s32.f32 %v129_v30  ;;  %v735_v40 = vld [vmem:[%s2397_s3 + $0x60] sm:$0xff]  ;;  %v737_v43 = vld [vmem:[%s2397_s3 + $0x70] sm:$0xff]  ;;  %v195_v52 = vcvt.s32.f32 %v131_v48  ;;  %v197_v53 = vcvt.s32.f32 %v133_v49 }
  0x19   :  { %762 = vperm.xlu0 %1955, %v724_v8   ;;  %448 = vmatpush.bf16.msra.mxu0 %v1810_v9  ;;  %v736_v39 = vld [vmem:[%s2397_s3 + $0x68] sm:$0xff]  ;;  %v254_v41 = vpack.c.bf16 %v192_v34, %v190_v33  ;;  %v739_v44 = vld [vmem:[%s2397_s3 + $0x80] sm:$0xff]  ;;  %v738_v45 = vld [vmem:[%s2397_s3 + $0x78] sm:$0xff]  ;;  %v256_v57 = vpack.c.bf16 %v196_v51, %v194_v50 }
  0x1a   :  { %537 = vmatpush.bf16.msra.mxu1 %v1818_v10  ;;  %782 = vperm.xlu2 %1957, %v728_v14   ;;  %v255_v42 = vpack.c.bf16 %v193_v36, %v191_v35  ;;  %v740_v54 = vld [vmem:[%s2397_s3 + $0x88] sm:$0xff]  ;;  %v742_v55 = vld [vmem:[%s2397_s3 + $0x98] sm:$0xff]  ;;  %v741_v56 = vld [vmem:[%s2397_s3 + $0x90] sm:$0xff]  ;;  %v257_v58 = vpack.c.bf16 %v197_v53, %v195_v52 }
  0x1b   :  { %v112_v59 = vld [vmem:[%s2394_s0 + $0x10] sm:$0xff]  ;;  %v113_v60 = vld [vmem:[%s2394_s0 + $0x18] sm:$0xff]  ;;  %v743_v61 = vld [vmem:[%s2397_s3 + $0xa0] sm:$0xff] }
  0x1c   :  { %v745_v62 = vld [vmem:[%s2397_s3 + $0xb0] sm:$0xff]  ;;  %v744_v63 = vld [vmem:[%s2397_s3 + $0xa8] sm:$0xff]  ;;  %v134_v0 = vunpack.c.0.s8 %v112_v59  ;;  %v136_v1 = vunpack.c.1.s8 %v112_v59  ;;  %v135_v2 = vunpack.c.0.s8 %v113_v60  ;;  %v137_v3 = vunpack.c.1.s8 %v113_v60  ;;  %v746_v8 = vld [vmem:[%s2397_s3 + $0xb8] sm:$0xff] }
  0x1d   :  { %449 = vmatpush.bf16.msra.mxu0 %v1809_v12  ;;  %v748_v9 = vld [vmem:[%s2397_s3 + $0xc8] sm:$0xff]  ;;  %v747_v10 = vld [vmem:[%s2397_s3 + $0xc0] sm:$0xff]  ;;  %v1828_v52 = vld [vmem:[#allocation6 + $0x38] sm:$0xff] }
  0x1e   :  { %538 = vmatpush.bf16.msra.mxu1 %v1817_v13  ;;  %v198_v4 = vcvt.s32.f32 %v134_v0  ;;  %v200_v5 = vcvt.s32.f32 %v136_v1  ;;  %v199_v6 = vcvt.s32.f32 %v135_v2  ;;  %v201_v7 = vcvt.s32.f32 %v137_v3  ;;  %v749_v13 = vld [vmem:[%s2397_s3 + $0xd0] sm:$0xff]  ;;  %v751_v14 = vld [vmem:[%s2397_s3 + $0xe0] sm:$0xff]  ;;  %v115_v30 = vld [vmem:[%s2394_s0 + $0x28] sm:$0xff]  ;;  %1308 = vmatpush.bf16.msra.mxu3 %v1828_v52 }
  0x1f   :  { %v114_v29 = vld [vmem:[%s2394_s0 + $0x20] sm:$0xff]  ;;  %v143_v33 = vunpack.c.0.s8 %v115_v30  ;;  %v145_v34 = vunpack.c.1.s8 %v115_v30  ;;  %v149_v46 = vunpack.c.3.s8 %v115_v30  ;;  %v1850_v51 = vld [vmem:[#allocation8 + $0x28] sm:$0xff]  ;;  %v1847_v1 = vld [vmem:[#allocation8 + $0x10] sm:$0xff] }
  0x20   :  { %792 = vperm.xlu1 %1956, %v730_v15   ;;  %v258_v11 = vpack.c.bf16 %v200_v5, %v198_v4  ;;  %v259_v12 = vpack.c.bf16 %v201_v7, %v199_v6  ;;  %v750_v15 = vld [vmem:[%s2397_s3 + $0xd8] sm:$0xff]  ;;  %v1825_v2 = vld [vmem:[#allocation6 + $0x20] sm:$0xff]  ;;  %v1846_v7 = vld [vmem:[#allocation8 + $0x8] sm:$0xff] }
  0x21   :  { %787 = vperm.xlu0 %1955, %v729_v16   ;;  %450 = vmatpush.bf16.msra.mxu0 %v1808_v17  ;;  %v138_v16 = vunpack.c.2.s8 %v112_v59  ;;  %v140_v17 = vunpack.c.3.s8 %v112_v59  ;;  %v213_v50 = vcvt.s32.f32 %v149_v46  ;;  %v1848_v59 = vld [vmem:[#allocation8 + $0x18] sm:$0xff] }
  0x22   :  { %539 = vmatpush.bf16.msra.mxu1 %v1816_v18  ;;  %797 = vperm.xlu2 %1957, %v731_v23   ;;  %v139_v18 = vunpack.c.2.s8 %v113_v60 }
  0x23   :  { %v204_v21 = vcvt.s32.f32 %v140_v17 }
  0x24   :  { %v203_v22 = vcvt.s32.f32 %v139_v18 }
  0x25   :  { %451 = vmatpush.bf16.msra.mxu0 %v1807_v19  ;;  %v141_v19 = vunpack.c.3.s8 %v113_v60  ;;  %v1826_v60 = vld [vmem:[#allocation6 + $0x28] sm:$0xff] }
  0x26   :  { %540 = vmatpush.bf16.msra.mxu1 %v1815_v20  ;;  %v202_v20 = vcvt.s32.f32 %v138_v16 }
  0x27   :  { %v205_v23 = vcvt.s32.f32 %v141_v19  ;;  %v1821_v19 = vld [vmem:[#allocation6] sm:$0xff] }
  0x28   :  { %807 = vperm.xlu1 %1956, %v733_v24   ;;  %v752_v24 = vld [vmem:[%s2397_s3 + $0xe8] sm:$0xff]  ;;  %v260_v27 = vpack.c.bf16 %v204_v21, %v202_v20 }
  0x29   :  { %802 = vperm.xlu0 %1955, %v732_v25   ;;  %452 = vmatpush.bf16.msra.mxu0 %v1806_v26  ;;  %v754_v25 = vld [vmem:[%s2397_s3 + $0xf8] sm:$0xff]  ;;  %v753_v26 = vld [vmem:[%s2397_s3 + $0xf0] sm:$0xff]  ;;  %v261_v28 = vpack.c.bf16 %v205_v23, %v203_v22 }
  0x2a   :  { %541 = vmatpush.bf16.msra.mxu1 %v1814_v31  ;;  %812 = vperm.xlu2 %1957, %v734_v38   ;;  %v142_v31 = vunpack.c.0.s8 %v114_v29  ;;  %v209_v38 = vcvt.s32.f32 %v145_v34 }
  0x2c   :  { %v206_v35 = vcvt.s32.f32 %v142_v31 }
  0x2d   :  { %453 = vmatpush.bf16.msra.mxu0 %v1805_v32  ;;  %v144_v32 = vunpack.c.1.s8 %v114_v29 }
  0x2e   :  { %542 = vmatpush.bf16.msra.mxu1 %v1813_v37  ;;  %v207_v37 = vcvt.s32.f32 %v143_v33 }
  0x2f   :  { %v208_v36 = vcvt.s32.f32 %v144_v32 }
  0x30   :  { %822 = vperm.xlu1 %1956, %v736_v39   ;;  %454 = vmatmul.bf16.vlgmr.msra.gmra.mxu0 %v254_v41  ;;  %v1852_v41 = vld [vmem:[#allocation8 + $0x38] sm:$0xff] }
  0x31   :  { %817 = vperm.xlu0 %1955, %v735_v40   ;;  %543 = vmatmul.bf16.vlgmr.msra.gmra.mxu1 %v255_v42  ;;  %v262_v39 = vpack.c.bf16 %v208_v36, %v206_v35  ;;  %v263_v40 = vpack.c.bf16 %v209_v38, %v207_v37  ;;  %v1851_v42 = vld [vmem:[#allocation8 + $0x30] sm:$0xff] }
  0x32   :  { %827 = vperm.xlu2 %1957, %v737_v43   ;;  %1171 = vmatpush.bf16.msra.mxu2 %v1852_v41  ;;  %v146_v43 = vunpack.c.2.s8 %v114_v29 }
  0x34   :  { %v210_v47 = vcvt.s32.f32 %v146_v43 }
  0x36   :  { %1172 = vmatpush.bf16.msra.mxu2 %v1851_v42  ;;  %v1831_v42 = vld [vmem:[#allocation3 + $0x10] sm:$0xff] }
  0x38   :  { %837 = vperm.xlu1 %1956, %v739_v44   ;;  %v148_v44 = vunpack.c.3.s8 %v114_v29 }
  0x39   :  { %832 = vperm.xlu0 %1955, %v738_v45   ;;  %v147_v45 = vunpack.c.2.s8 %v115_v30 }
  0x3a   :  { %842 = vperm.xlu2 %1957, %v740_v54   ;;  %v212_v48 = vcvt.s32.f32 %v148_v44  ;;  %1173 = vmatpush.bf16.msra.mxu2 %v1850_v51 }
  0x3b   :  { %v211_v49 = vcvt.s32.f32 %v147_v45 }
  0x3c   :  { %v264_v53 = vpack.c.bf16 %v212_v48, %v210_v47 }
  0x3d   :  { %v265_v54 = vpack.c.bf16 %v213_v50, %v211_v49 }
  0x40   :  { %852 = vperm.xlu1 %1956, %v742_v55   ;;  %459 = vmatmul.bf16.gmra.mxu0 %v256_v57  ;;  %v1849_v55 = vld [vmem:[#allocation8 + $0x20] sm:$0xff]  ;;  %v116_v57 = vld [vmem:[%s2394_s0 + $0x30] sm:$0xff] }
  0x41   :  { %847 = vperm.xlu0 %1955, %v741_v56   ;;  %548 = vmatmul.bf16.gmra.mxu1 %v257_v58  ;;  %v1827_v56 = vld [vmem:[#allocation6 + $0x30] sm:$0xff]  ;;  %v117_v58 = vld [vmem:[%s2394_s0 + $0x38] sm:$0xff]  ;;  %v156_v16 = vunpack.c.3.s8 %v116_v57 }
  0x42   :  { %857 = vperm.xlu2 %1957, %v743_v61   ;;  %1174 = vmatpush.bf16.msra.mxu2 %v1849_v55  ;;  %v150_v61 = vunpack.c.0.s8 %v116_v57  ;;  %v153_v0 = vunpack.c.1.s8 %v117_v58  ;;  %v155_v17 = vunpack.c.2.s8 %v117_v58  ;;  %v157_v18 = vunpack.c.3.s8 %v117_v58 }
  0x43   :  { %1309 = vmatpush.bf16.msra.mxu3 %v1827_v56  ;;  %v220_v21 = vcvt.s32.f32 %v156_v16 }
  0x44   :  { %v214_v3 = vcvt.s32.f32 %v150_v61  ;;  %v217_v6 = vcvt.s32.f32 %v153_v0  ;;  %v219_v22 = vcvt.s32.f32 %v155_v17  ;;  %v221_v23 = vcvt.s32.f32 %v157_v18  ;;  %v120_v0 = vld [vmem:[%s2394_s0 + $0x50] sm:$0xff] }
  0x46   :  { %1175 = vmatpush.bf16.msra.mxu2 %v1848_v59 }
  0x47   :  { %1310 = vmatpush.bf16.msra.mxu3 %v1826_v60 }
  0x48   :  { %867 = vperm.xlu1 %1956, %v745_v62   ;;  %v152_v62 = vunpack.c.1.s8 %v116_v57 }
  0x49   :  { %862 = vperm.xlu0 %1955, %v744_v63   ;;  %v151_v63 = vunpack.c.0.s8 %v117_v58 }
  0x4a   :  { %872 = vperm.xlu2 %1957, %v746_v8   ;;  %v216_v4 = vcvt.s32.f32 %v152_v62  ;;  %1176 = vmatpush.bf16.msra.mxu2 %v1847_v1  ;;  %v1824_v8 = vld [vmem:[#allocation6 + $0x18] sm:$0xff] }
  0x4b   :  { %v215_v5 = vcvt.s32.f32 %v151_v63  ;;  %1311 = vmatpush.bf16.msra.mxu3 %v1825_v2  ;;  %v1832_v1 = vld [vmem:[#allocation3 + $0x18] sm:$0xff] }
  0x4c   :  { %v121_v2 = vld [vmem:[%s2394_s0 + $0x58] sm:$0xff] }
  0x4e   :  { %1177 = vmatpush.bf16.msra.mxu2 %v1846_v7  ;;  %v169_v7 = vunpack.c.1.s8 %v121_v2 }
  0x4f   :  { %1312 = vmatpush.bf16.msra.mxu3 %v1824_v8 }
  0x50   :  { %882 = vperm.xlu1 %1956, %v748_v9   ;;  %464 = vmatmul.bf16.gmra.mxu0 %v258_v11  ;;  %v266_v9 = vpack.c.bf16 %v216_v4, %v214_v3  ;;  %v1845_v11 = vld [vmem:[#allocation8] sm:$0xff]  ;;  %v166_v3 = vunpack.c.0.s8 %v120_v0  ;;  %v168_v4 = vunpack.c.1.s8 %v120_v0  ;;  %v233_v17 = vcvt.s32.f32 %v169_v7 }
  0x51   :  { %877 = vperm.xlu0 %1955, %v747_v10   ;;  %553 = vmatmul.bf16.gmra.mxu1 %v259_v12  ;;  %v267_v10 = vpack.c.bf16 %v217_v6, %v215_v5  ;;  %v1823_v12 = vld [vmem:[#allocation6 + $0x10] sm:$0xff]  ;;  %v167_v6 = vunpack.c.0.s8 %v121_v2 }
  0x52   :  { %887 = vperm.xlu2 %1957, %v749_v13   ;;  %1178 = vmatpush.bf16.msra.mxu2 %v1845_v11  ;;  %v1829_v13 = vld [vmem:[#allocation3] sm:$0xff] }
  0x53   :  { %1313 = vmatpush.bf16.msra.mxu3 %v1823_v12  ;;  %v230_v12 = vcvt.s32.f32 %v166_v3  ;;  %v231_v16 = vcvt.s32.f32 %v167_v6 }
  0x55   :  { %1179 = vmatmul.bf16.vlgmr.msra.gmra.mxu2 %v1829_v13  ;;  %v232_v13 = vcvt.s32.f32 %v168_v4 }
  0x58   :  { %897 = vperm.xlu1 %1956, %v751_v14   ;;  %v1822_v14 = vld [vmem:[#allocation6 + $0x8] sm:$0xff] }
  0x59   :  { %892 = vperm.xlu0 %1955, %v750_v15   ;;  %v154_v15 = vunpack.c.2.s8 %v116_v57  ;;  %1314 = vmatpush.bf16.msra.mxu3 %v1822_v14 }
  0x5a   :  { %902 = vperm.xlu2 %1957, %v752_v24  }
  0x5b   :  { %v218_v20 = vcvt.s32.f32 %v154_v15 }
  0x5d   :  { %1315 = vmatpush.bf16.msra.mxu3 %v1821_v19  ;;  %v268_v24 = vpack.c.bf16 %v220_v21, %v218_v20  ;;  %v274_v20 = vpack.c.bf16 %v232_v13, %v230_v12  ;;  %v275_v21 = vpack.c.bf16 %v233_v17, %v231_v16 }
  0x60   :  { %912 = vperm.xlu1 %1956, %v754_v25   ;;  %469 = vmatmul.bf16.gmra.mxu0 %v260_v27  ;;  %v269_v25 = vpack.c.bf16 %v221_v23, %v219_v22  ;;  %v119_v27 = vld [vmem:[%s2394_s0 + $0x48] sm:$0xff] }
  0x61   :  { %907 = vperm.xlu0 %1955, %v753_v26   ;;  %558 = vmatmul.bf16.gmra.mxu1 %v261_v28  ;;  %v118_v26 = vld [vmem:[%s2394_s0 + $0x40] sm:$0xff]  ;;  %v1830_v28 = vld [vmem:[#allocation3 + $0x8] sm:$0xff]  ;;  %v159_v31 = vunpack.c.0.s8 %v119_v27  ;;  %v161_v32 = vunpack.c.1.s8 %v119_v27  ;;  %v163_v46 = vunpack.c.2.s8 %v119_v27  ;;  %v165_v47 = vunpack.c.3.s8 %v119_v27 }
  0x62   :  { %v158_v29 = vunpack.c.0.s8 %v118_v26  ;;  %v160_v30 = vunpack.c.1.s8 %v118_v26  ;;  %v162_v43 = vunpack.c.2.s8 %v118_v26  ;;  %v164_v44 = vunpack.c.3.s8 %v118_v26 }
  0x63   :  { %v223_v35 = vcvt.s32.f32 %v159_v31  ;;  %v225_v36 = vcvt.s32.f32 %v161_v32  ;;  %v227_v56 = vcvt.s32.f32 %v163_v46  ;;  %v229_v57 = vcvt.s32.f32 %v165_v47  ;;  %v1834_v46 = vld [vmem:[#allocation3 + $0x28] sm:$0xff] }
  0x64   :  { %v222_v33 = vcvt.s32.f32 %v158_v29  ;;  %v224_v34 = vcvt.s32.f32 %v160_v30  ;;  %v226_v52 = vcvt.s32.f32 %v162_v43  ;;  %v172_v26 = vunpack.c.3.s8 %v120_v0  ;;  %v123_v47 = vld [vmem:[%s2394_s0 + $0x68] sm:$0xff] }
  0x65   :  { %1184 = vmatmul.bf16.gmra.mxu2 %v1830_v28  ;;  %v273_v61 = vpack.c.bf16 %v229_v57, %v227_v56  ;;  %v171_v28 = vunpack.c.2.s8 %v121_v2  ;;  %v173_v29 = vunpack.c.3.s8 %v121_v2 }
  0x66   :  { %v270_v38 = vpack.c.bf16 %v224_v34, %v222_v33 }
  0x6c   :  { %v778_v19 = vpop.permute.xlu2 %777 }
  0x70   :  { %474 = vmatmul.bf16.gmra.mxu0 %v262_v39  ;;  %v271_v39 = vpack.c.bf16 %v225_v36, %v223_v35  ;;  %v236_v35 = vcvt.s32.f32 %v172_v26 }
  0x71   :  { %563 = vmatmul.bf16.gmra.mxu1 %v263_v40 }
  0x74   :  { %v783_v33 = vpop.permute.xlu2 %782 }
  0x75   :  { %1189 = vmatmul.bf16.gmra.mxu2 %v1831_v42 }
  0x80   :  { %479 = vmatmul.bf16.gmra.mxu0 %v264_v53  ;;  %v228_v53 = vcvt.s32.f32 %v164_v44 }
  0x81   :  { %568 = vmatmul.bf16.gmra.mxu1 %v265_v54 }
  0x82   :  { %v768_v59 = vpop.permute.xlu1 %767  ;;  %v272_v60 = vpack.c.bf16 %v228_v53, %v226_v52  ;;  %v177_v52 = vunpack.c.1.s8 %v123_v47 }
  0x83   :  { %v758_v37 = vpop.permute.xlu0 %757 }
  0x85   :  { %1194 = vmatmul.bf16.gmra.mxu2 %v1832_v1 }
  0x8a   :  { %v773_v11 = vpop.permute.xlu1 %772 }
  0x8b   :  { %v763_v51 = vpop.permute.xlu0 %762 }
  0x90   :  { %484 = vmatmul.bf16.gmra.mxu0 %v266_v9 }
  0x91   :  { %573 = vmatmul.bf16.gmra.mxu1 %v267_v10 }
  0x92   :  { %v793_v56 = vpop.permute.xlu1 %792 }
  0x93   :  { %v788_v57 = vpop.permute.xlu0 %787 }
  0xa0   :  { %489 = vmatmul.bf16.gmra.mxu0 %v268_v24  ;;  %v1833_v24 = vld [vmem:[#allocation3 + $0x20] sm:$0xff] }
  0xa1   :  { %578 = vmatmul.bf16.gmra.mxu1 %v269_v25  ;;  %v170_v25 = vunpack.c.2.s8 %v120_v0  ;;  %1199 = vmatmul.bf16.gmra.mxu2 %v1833_v24 }
  0xa3   :  { %v234_v34 = vcvt.s32.f32 %v170_v25 }
  0xad   :  { %v455_v40 = vpop.f32.mrf.mxu0 }
  0xae   :  { %v544_v41 = vpop.f32.mrf.mxu1 }
  0xaf   :  { %v545_v45 = vadd.f32 %v544_v41, %v455_v40  ;;  %v276_v41 = vpack.c.bf16 %v236_v35, %v234_v34 }
  0xb0   :  { %494 = vmatmul.bf16.gmra.mxu0 %v270_v38  ;;  %v235_v38 = vcvt.s32.f32 %v171_v28  ;;  %v1836_v28 = vld [vmem:[#allocation3 + $0x38] sm:$0xff] }
  0xb1   :  { %583 = vmatmul.bf16.gmra.mxu1 %v271_v39  ;;  %v915_v54 = vmul.f32 %v758_v37, %v545_v45  ;;  %v237_v39 = vcvt.s32.f32 %v173_v29  ;;  %v122_v45 = vld [vmem:[%s2394_s0 + $0x60] sm:$0xff]  ;;  %1204 = vmatmul.bf16.gmra.mxu2 %v1834_v46  ;;  %v125_v29 = vld [vmem:[%s2394_s0 + $0x78] sm:$0xff] }
  0xb2   :  { %v178_v6 = vunpack.c.2.s8 %v122_v45  ;;  %v180_v7 = vunpack.c.3.s8 %v122_v45  ;;  %v185_v34 = vunpack.c.1.s8 %v125_v29 }
  0xb3   :  { %v277_v42 = vpack.c.bf16 %v237_v39, %v235_v38  ;;  %v808_v38 = vpop.permute.xlu1 %807 }
  0xb4   :  { %v242_v16 = vcvt.s32.f32 %v178_v6  ;;  %v244_v17 = vcvt.s32.f32 %v180_v7 }
  0xb5   :  { %v457_v48 = vpop.f32.mrf.mxu0 }
  0xb6   :  { %v546_v49 = vpop.f32.mrf.mxu1 }
  0xb7   :  { %v547_v50 = vadd.f32 %v546_v49, %v457_v48  ;;  %v174_v48 = vunpack.c.0.s8 %v122_v45  ;;  %v176_v49 = vunpack.c.1.s8 %v122_v45  ;;  %v249_v45 = vcvt.s32.f32 %v185_v34 }
  0xb9   :  { %v916_v55 = vmul.f32 %v763_v51, %v547_v50  ;;  %v175_v51 = vunpack.c.0.s8 %v123_v47 }
  0xbb   :  { %v947_v58 = vpack.c.bf16 %v916_v55, %v915_v54 }
  0xbd   :  { %1316 = vmatmul.bf16.vlgmr.msra.gmra.mxu3 %v947_v58  ;;  %v460_v62 = vpop.f32.mrf.mxu0  ;;  %v238_v58 = vcvt.s32.f32 %v174_v48 }
  0xbe   :  { %v549_v63 = vpop.f32.mrf.mxu1 }
  0xbf   :  { %v550_v5 = vadd.f32 %v549_v63, %v460_v62  ;;  %v239_v62 = vcvt.s32.f32 %v175_v51  ;;  %v241_v63 = vcvt.s32.f32 %v177_v52  ;;  %v1837_v51 = vld [vmem:[#allocation3 + $0x40] sm:$0xff] }
  0xc0   :  { %499 = vmatmul.bf16.gmra.mxu0 %v272_v60 }
  0xc1   :  { %588 = vmatmul.bf16.gmra.mxu1 %v273_v61  ;;  %v917_v14 = vmul.f32 %v768_v59, %v550_v5  ;;  %v240_v59 = vcvt.s32.f32 %v176_v49  ;;  %v279_v2 = vpack.c.bf16 %v241_v63, %v239_v62  ;;  %v1835_v5 = vld [vmem:[#allocation3 + $0x30] sm:$0xff] }
  0xc2   :  { %1209 = vmatmul.bf16.gmra.mxu2 %v1835_v5 }
  0xc3   :  { %v278_v1 = vpack.c.bf16 %v240_v59, %v238_v58  ;;  %v823_v59 = vpop.permute.xlu1 %822 }
  0xc5   :  { %v462_v8 = vpop.f32.mrf.mxu0 }
  0xc6   :  { %v551_v9 = vpop.f32.mrf.mxu1 }
  0xc7   :  { %v552_v10 = vadd.f32 %v551_v9, %v462_v8  ;;  %v179_v9 = vunpack.c.2.s8 %v123_v47 }
  0xc9   :  { %v918_v15 = vmul.f32 %v773_v11, %v552_v10  ;;  %v181_v10 = vunpack.c.3.s8 %v123_v47 }
  0xcb   :  { %v948_v18 = vpack.c.bf16 %v918_v15, %v917_v14  ;;  %v798_v14 = vpop.permute.xlu2 %797  ;;  %v803_v15 = vpop.permute.xlu0 %802 }
  0xcd   :  { %1321 = vmatmul.bf16.gmra.mxu3 %v948_v18  ;;  %v465_v22 = vpop.f32.mrf.mxu0 }
  0xce   :  { %v554_v23 = vpop.f32.mrf.mxu1 }
  0xcf   :  { %v555_v27 = vadd.f32 %v554_v23, %v465_v22  ;;  %v280_v23 = vpack.c.bf16 %v244_v17, %v242_v16 }
  0xd0   :  { %504 = vmatmul.bf16.gmra.mxu0 %v274_v20  ;;  %v243_v20 = vcvt.s32.f32 %v179_v9 }
  0xd1   :  { %593 = vmatmul.bf16.gmra.mxu1 %v275_v21  ;;  %v919_v36 = vmul.f32 %v778_v19, %v555_v27  ;;  %v245_v21 = vcvt.s32.f32 %v181_v10  ;;  %v124_v27 = vld [vmem:[%s2394_s0 + $0x70] sm:$0xff] }
  0xd2   :  { %1214 = vmatmul.bf16.gmra.mxu2 %v1836_v28  ;;  %v186_v52 = vunpack.c.2.s8 %v124_v27 }
  0xd3   :  { %v281_v24 = vpack.c.bf16 %v245_v21, %v243_v20  ;;  %v813_v39 = vpop.permute.xlu2 %812 }
  0xd4   :  { %v250_v62 = vcvt.s32.f32 %v186_v52 }
  0xd5   :  { %v467_v30 = vpop.f32.mrf.mxu0 }
  0xd6   :  { %v556_v31 = vpop.f32.mrf.mxu1 }
  0xd7   :  { %v557_v32 = vadd.f32 %v556_v31, %v467_v30  ;;  %v182_v30 = vunpack.c.0.s8 %v124_v27  ;;  %v184_v31 = vunpack.c.1.s8 %v124_v27 }
  0xd9   :  { %v920_v37 = vmul.f32 %v783_v33, %v557_v32  ;;  %v183_v33 = vunpack.c.0.s8 %v125_v29 }
  0xdb   :  { %v949_v40 = vpack.c.bf16 %v920_v37, %v919_v36 }
  0xdd   :  { %1326 = vmatmul.bf16.gmra.mxu3 %v949_v40  ;;  %v470_v43 = vpop.f32.mrf.mxu0  ;;  %v246_v40 = vcvt.s32.f32 %v182_v30 }
  0xde   :  { %v559_v44 = vpop.f32.mrf.mxu1 }
  0xdf   :  { %v560_v50 = vadd.f32 %v559_v44, %v470_v43  ;;  %v247_v44 = vcvt.s32.f32 %v183_v33 }
  0xe0   :  { %509 = vmatmul.bf16.gmra.mxu0 %v276_v41  ;;  %v248_v41 = vcvt.s32.f32 %v184_v31  ;;  %v838_v31 = vpop.permute.xlu1 %837 }
  0xe1   :  { %598 = vmatmul.bf16.gmra.mxu1 %v277_v42  ;;  %v921_v60 = vmul.f32 %v788_v57, %v560_v50  ;;  %v283_v48 = vpack.c.bf16 %v249_v45, %v247_v44 }
  0xe2   :  { %v282_v47 = vpack.c.bf16 %v248_v41, %v246_v40  ;;  %1219 = vmatmul.bf16.gmra.mxu2 %v1837_v51  ;;  %v2327_v41 = vld [vmem:[%s2400_s6] ss:$0 sm:$0xff]  ;;  %s2067_s6 = smov [#allocation9]  }
  0xe3   :  { %s1597_s20 = sshll.u32 %s2067_s6, 4  ;;  %s1598_s20 = int_to_ptr.vmem [resolvable:$true] %s1597_s20 }
  0xe5   :  { %v472_v53 = vpop.f32.mrf.mxu0 }
  0xe6   :  { %v561_v54 = vpop.f32.mrf.mxu1 }
  0xe7   :  { %v562_v55 = vadd.f32 %v561_v54, %v472_v53  ;;  %v188_v53 = vunpack.c.3.s8 %v124_v27 }
  0xe9   :  { %v922_v61 = vmul.f32 %v793_v56, %v562_v55  ;;  %v187_v55 = vunpack.c.2.s8 %v125_v29  ;;  %v189_v56 = vunpack.c.3.s8 %v125_v29  ;;  %v252_v63 = vcvt.s32.f32 %v188_v53 }
  0xeb   :  { %v950_v0 = vpack.c.bf16 %v922_v61, %v921_v60  ;;  %v818_v61 = vpop.permute.xlu0 %817  ;;  %v284_v6 = vpack.c.bf16 %v252_v63, %v250_v62 }
  0xed   :  { %1331 = vmatmul.bf16.gmra.mxu3 %v950_v0  ;;  %v475_v3 = vpop.f32.mrf.mxu0  ;;  %v1180_v0 = vpop.f32.mrf.mxu2 }
  0xee   :  { %v564_v4 = vpop.f32.mrf.mxu1 }
  0xef   :  { %v565_v8 = vadd.f32 %v564_v4, %v475_v3  ;;  %v251_v3 = vcvt.s32.f32 %v187_v55  ;;  %v253_v4 = vcvt.s32.f32 %v189_v56 }
  0xf0   :  { %514 = vmatmul.bf16.gmra.mxu0 %v278_v1 }
  0xf1   :  { %603 = vmatmul.bf16.gmra.mxu1 %v279_v2  ;;  %v923_v18 = vmul.f32 %v798_v14, %v565_v8  ;;  %v285_v7 = vpack.c.bf16 %v253_v4, %v251_v3  ;;  %v1841_v3 = vld [vmem:[#allocation3 + $0x60] sm:$0xff] }
  0xf3   :  { %v833_v17 = vpop.permute.xlu0 %832 }
  0xf5   :  { %v477_v11 = vpop.f32.mrf.mxu0  ;;  %v1182_v10 = vpop.f32.mrf.mxu2 }
  0xf6   :  { %v566_v12 = vpop.f32.mrf.mxu1 }
  0xf7   :  { %v567_v13 = vadd.f32 %v566_v12, %v477_v11  ;;  %v1838_v11 = vld [vmem:[#allocation3 + $0x48] sm:$0xff] }
  0xf8   :  { %1224 = vmatmul.bf16.gmra.mxu2 %v1838_v11 }
  0xf9   :  { %v924_v19 = vmul.f32 %v803_v15, %v567_v13  ;;  %v828_v15 = vpop.permute.xlu2 %827 }
  0xfb   :  { %v951_v22 = vpack.c.bf16 %v924_v19, %v923_v18 }
  0xfd   :  { %1336 = vmatmul.bf16.gmra.mxu3 %v951_v22  ;;  %v480_v25 = vpop.f32.mrf.mxu0  ;;  %v1185_v18 = vpop.f32.mrf.mxu2 }
  0xfe   :  { %v569_v26 = vpop.f32.mrf.mxu1 }
  0xff   :  { %v570_v32 = vadd.f32 %v569_v26, %v480_v25  ;;  %v1839_v25 = vld [vmem:[#allocation3 + $0x50] sm:$0xff] }
 0x100   :  { %519 = vmatmul.bf16.gmra.mxu0 %v280_v23 }
 0x101   :  { %608 = vmatmul.bf16.gmra.mxu1 %v281_v24  ;;  %v925_v42 = vmul.f32 %v808_v38, %v570_v32  ;;  %v843_v29 = vpop.permute.xlu2 %842 }
 0x105   :  { %v482_v35 = vpop.f32.mrf.mxu0  ;;  %v2318_v24 = vpop.f32.mrf.mxu2 }
 0x106   :  { %v571_v36 = vpop.f32.mrf.mxu1 }
 0x107   :  { %v572_v37 = vadd.f32 %v571_v36, %v482_v35 }
 0x108   :  { %1229 = vmatmul.bf16.gmra.mxu2 %v1839_v25 }
 0x109   :  { %v926_v43 = vmul.f32 %v813_v39, %v572_v37 }
 0x10b   :  { %v952_v46 = vpack.c.bf16 %v926_v43, %v925_v42  ;;  %v1840_v42 = vld [vmem:[#allocation3 + $0x58] sm:$0xff] }
 0x10d   :  { %1341 = vmatmul.bf16.gmra.mxu3 %v952_v46  ;;  %v485_v49 = vpop.f32.mrf.mxu0  ;;  %v2320_v32 = vpop.f32.mrf.mxu2 }
 0x10e   :  { %v574_v50 = vpop.f32.mrf.mxu1  ;;  %v853_v46 = vpop.permute.xlu1 %852 }
 0x10f   :  { %v575_v54 = vadd.f32 %v574_v50, %v485_v49 }
 0x110   :  { %524 = vmatmul.bf16.gmra.mxu0 %v282_v47  ;;  %v848_v47 = vpop.permute.xlu0 %847 }
 0x111   :  { %613 = vmatmul.bf16.gmra.mxu1 %v283_v48  ;;  %v927_v1 = vmul.f32 %v818_v61, %v575_v54 }
 0x115   :  { %v487_v57 = vpop.f32.mrf.mxu0  ;;  %v2322_v39 = vpop.f32.mrf.mxu2 }
 0x116   :  { %v576_v58 = vpop.f32.mrf.mxu1 }
 0x117   :  { %v577_v60 = vadd.f32 %v576_v58, %v487_v57 }
 0x118   :  { %1234 = vmatmul.bf16.gmra.mxu2 %v1840_v42 }
 0x119   :  { %v928_v2 = vmul.f32 %v823_v59, %v577_v60 }
 0x11b   :  { %v953_v5 = vpack.c.bf16 %v928_v2, %v927_v1 }
 0x11d   :  { %1346 = vmatmul.bf16.gmra.mxu3 %v953_v5  ;;  %v490_v8 = vpop.f32.mrf.mxu0  ;;  %v2330_v51 = vpop.f32.mrf.mxu2 }
 0x11e   :  { %v579_v9 = vpop.f32.mrf.mxu1 }
 0x11f   :  { %v580_v12 = vadd.f32 %v579_v9, %v490_v8  ;;  %v863_v8 = vpop.permute.xlu0 %862 }
 0x120   :  { %529 = vmatmul.bf16.gmra.mxu0 %v284_v6 }
 0x121   :  { %618 = vmatmul.bf16.gmra.mxu1 %v285_v7  ;;  %v929_v19 = vmul.f32 %v828_v15, %v580_v12  ;;  %v858_v7 = vpop.permute.xlu2 %857 }
 0x125   :  { %v492_v13 = vpop.f32.mrf.mxu0  ;;  %v2333_v1 = vpop.f32.mrf.mxu2 }
 0x126   :  { %v581_v14 = vpop.f32.mrf.mxu1 }
 0x127   :  { %v582_v16 = vadd.f32 %v581_v14, %v492_v13 }
 0x128   :  { %1239 = vmatmul.bf16.gmra.mxu2 %v1841_v3 }
 0x129   :  { %v930_v20 = vmul.f32 %v833_v17, %v582_v16 }
 0x12b   :  { %v954_v21 = vpack.c.bf16 %v930_v20, %v929_v19 }
 0x12d   :  { %1351 = vmatmul.bf16.gmra.mxu3 %v954_v21  ;;  %v495_v22 = vpop.f32.mrf.mxu0  ;;  %v2336_v12 = vpop.f32.mrf.mxu2 }
 0x12e   :  { %v584_v23 = vpop.f32.mrf.mxu1 }
 0x12f   :  { %v585_v26 = vadd.f32 %v584_v23, %v495_v22 }
 0x131   :  { %v931_v33 = vmul.f32 %v838_v31, %v585_v26 }
 0x135   :  { %v497_v27 = vpop.f32.mrf.mxu0 }
 0x136   :  { %v586_v28 = vpop.f32.mrf.mxu1 }
 0x137   :  { %v587_v30 = vadd.f32 %v586_v28, %v497_v27  ;;  %v2340_v27 = vpop.f32.mrf.mxu2 }
 0x139   :  { %v932_v34 = vmul.f32 %v843_v29, %v587_v30 }
 0x13b   :  { %v955_v35 = vpack.c.bf16 %v932_v34, %v931_v33  ;;  %v868_v33 = vpop.permute.xlu1 %867  ;;  %v873_v34 = vpop.permute.xlu2 %872 }
 0x13d   :  { %1356 = vmatmul.bf16.gmra.mxu3 %v955_v35  ;;  %v500_v36 = vpop.f32.mrf.mxu0 }
 0x13e   :  { %v589_v37 = vpop.f32.mrf.mxu1 }
 0x13f   :  { %v590_v43 = vadd.f32 %v589_v37, %v500_v36 }
 0x140   :  { %v1317_v38 = vpop.f32.mrf.mxu3 }
 0x141   :  { %v1318_v40 = vadd.f32 %v1317_v38, %v1180_v0  ;;  %v933_v52 = vmul.f32 %v848_v47, %v590_v43  ;;  %v2344_v38 = vpop.f32.mrf.mxu2 }
 0x143   :  { %v1401_v48 = vadd.f32 %v2327_v41, %v1318_v40 }
 0x145   :  { %v502_v44 = vpop.f32.mrf.mxu0  ;;  %v1465_v55 = vmul.f32 0.2, %v1401_v48  ;;  %vm1433_vm0 = vcmp.gt.f32.partialorder %v1401_v48, 0.0 }
 0x146   :  { %v591_v45 = vpop.f32.mrf.mxu1 }
 0x147   :  { %v592_v49 = vadd.f32 %v591_v45, %v502_v44  ;;  %v1497_v61 = vsel %vm1433_vm0, %v1401_v48, %v1465_v55 }
 0x148   :  { %v1319_v50 = vpop.f32.mrf.mxu3 }
 0x149   :  { %v934_v53 = vmul.f32 %v853_v46, %v592_v49  ;;  %v1320_v54 = vadd.f32 %v1319_v50, %v1182_v10 }
 0x14b   :  { %v1402_v56 = vadd.f32 %v2327_v41, %v1320_v54  ;;  %v956_v57 = vpack.c.bf16 %v934_v53, %v933_v52  ;;  %v2348_v54 = vpop.f32.mrf.mxu2 }
 0x14d   :  { %vm1434_vm1 = vcmp.gt.f32.partialorder %v1402_v56, 0.0  ;;  %v1466_v58 = vmul.f32 0.2, %v1402_v56  ;;  %1361 = vmatmul.bf16.gmra.mxu3 %v956_v57  ;;  %v505_v59 = vpop.f32.mrf.mxu0 }
 0x14e   :  { %v594_v60 = vpop.f32.mrf.mxu1 }
 0x14f   :  { %v1498_v62 = vsel %vm1434_vm1, %v1402_v56, %v1466_v58  ;;  %v595_v4 = vadd.f32 %v594_v60, %v505_v59  ;;  %v883_v59 = vpop.permute.xlu1 %882 }
 0x150   :  { %v1856_v63 = vpack.c.bf16 %v1498_v62, %v1497_v61  ;;  %v1322_v0 = vpop.f32.mrf.mxu3  ;;  %v878_v62 = vpop.permute.xlu0 %877 }
 0x151   :  { %v1323_v2 = vadd.f32 %v1322_v0, %v1185_v18  ;;  %v935_v13 = vmul.f32 %v858_v7, %v595_v4 }
 0x152   :  { %1857 = vst [vmem:[#allocation9] sm:$0xff] %v1856_v63  }
 0x153   :  { %v1403_v9 = vadd.f32 %v2327_v41, %v1323_v2  ;;  %v2353_v4 = vpop.f32.mrf.mxu2 }
 0x155   :  { %v507_v5 = vpop.f32.mrf.mxu0  ;;  %v1467_v16 = vmul.f32 0.2, %v1403_v9  ;;  %vm1435_vm2 = vcmp.gt.f32.partialorder %v1403_v9, 0.0 }
 0x156   :  { %v596_v6 = vpop.f32.mrf.mxu1 }
 0x157   :  { %v597_v10 = vadd.f32 %v596_v6, %v507_v5  ;;  %v1499_v22 = vsel %vm1435_vm2, %v1403_v9, %v1467_v16  ;;  %v1844_v16 = vld [vmem:[#allocation3 + $0x78] sm:$0xff] }
 0x158   :  { %v1324_v11 = vpop.f32.mrf.mxu3 }
 0x159   :  { %v936_v14 = vmul.f32 %v863_v8, %v597_v10  ;;  %v1325_v15 = vadd.f32 %v1324_v11, %v2318_v24  ;;  %v1842_v24 = vld [vmem:[#allocation3 + $0x68] sm:$0xff] }
 0x15a   :  { %1244 = vmatmul.bf16.gmra.mxu2 %v1842_v24 }
 0x15b   :  { %v1404_v17 = vadd.f32 %v2327_v41, %v1325_v15  ;;  %v957_v18 = vpack.c.bf16 %v936_v14, %v935_v13 }
 0x15d   :  { %vm1436_vm3 = vcmp.gt.f32.partialorder %v1404_v17, 0.0  ;;  %v1468_v19 = vmul.f32 0.2, %v1404_v17  ;;  %1366 = vmatmul.bf16.gmra.mxu3 %v957_v18  ;;  %v510_v20 = vpop.f32.mrf.mxu0 }
 0x15e   :  { %v599_v21 = vpop.f32.mrf.mxu1 }
 0x15f   :  { %v1500_v23 = vsel %vm1436_vm3, %v1404_v17, %v1468_v19  ;;  %v600_v29 = vadd.f32 %v599_v21, %v510_v20  ;;  %v888_v20 = vpop.permute.xlu2 %887 }
 0x160   :  { %v1861_v25 = vpack.c.bf16 %v1500_v23, %v1499_v22  ;;  %v1327_v26 = vpop.f32.mrf.mxu3  ;;  %v893_v23 = vpop.permute.xlu0 %892 }
 0x161   :  { %v1328_v28 = vadd.f32 %v1327_v26, %v2320_v32  ;;  %v937_v40 = vmul.f32 %v868_v33, %v600_v29 }
 0x162   :  { %1933 = vst [vmem:[#allocation9 + $0x8] sm:$0xff] %v1861_v25  }
 0x163   :  { %v1405_v35 = vadd.f32 %v2327_v41, %v1328_v28 }
 0x165   :  { %v512_v30 = vpop.f32.mrf.mxu0  ;;  %v1469_v44 = vmul.f32 0.2, %v1405_v35  ;;  %vm1437_vm4 = vcmp.gt.f32.partialorder %v1405_v35, 0.0 }
 0x166   :  { %v601_v31 = vpop.f32.mrf.mxu1 }
 0x167   :  { %v602_v36 = vadd.f32 %v601_v31, %v512_v30  ;;  %v1501_v49 = vsel %vm1437_vm4, %v1405_v35, %v1469_v44 }
 0x168   :  { %v1329_v37 = vpop.f32.mrf.mxu3 }
 0x169   :  { %v938_v42 = vmul.f32 %v873_v34, %v602_v36  ;;  %v1330_v43 = vadd.f32 %v1329_v37, %v2322_v39  ;;  %v1843_v39 = vld [vmem:[#allocation3 + $0x70] sm:$0xff] }
 0x16a   :  { %1249 = vmatmul.bf16.gmra.mxu2 %v1843_v39 }
 0x16b   :  { %v1406_v32 = vadd.f32 %v2327_v41, %v1330_v43  ;;  %v958_v45 = vpack.c.bf16 %v938_v42, %v937_v40 }
 0x16d   :  { %vm1438_vm5 = vcmp.gt.f32.partialorder %v1406_v32, 0.0  ;;  %v1470_v46 = vmul.f32 0.2, %v1406_v32  ;;  %1371 = vmatmul.bf16.gmra.mxu3 %v958_v45  ;;  %v515_v47 = vpop.f32.mrf.mxu0  ;;  %v898_v45 = vpop.permute.xlu1 %897 }
 0x16e   :  { %v604_v48 = vpop.f32.mrf.mxu1 }
 0x16f   :  { %v1502_v50 = vsel %vm1438_vm5, %v1406_v32, %v1470_v46  ;;  %v605_v56 = vadd.f32 %v604_v48, %v515_v47  ;;  %v903_v46 = vpop.permute.xlu2 %902 }
 0x170   :  { %v1866_v52 = vpack.c.bf16 %v1502_v50, %v1501_v49  ;;  %v1332_v53 = vpop.f32.mrf.mxu3 }
 0x171   :  { %v1333_v55 = vadd.f32 %v1332_v53, %v2330_v51  ;;  %v939_v0 = vmul.f32 %v878_v62, %v605_v56 }
 0x172   :  { %1934 = vst [vmem:[#allocation9 + $0x10] sm:$0xff] %v1866_v52  }
 0x173   :  { %v1407_v60 = vadd.f32 %v2327_v41, %v1333_v55 }
 0x175   :  { %v517_v57 = vpop.f32.mrf.mxu0  ;;  %v1471_v5 = vmul.f32 0.2, %v1407_v60  ;;  %vm1439_vm6 = vcmp.gt.f32.partialorder %v1407_v60, 0.0 }
 0x176   :  { %v606_v58 = vpop.f32.mrf.mxu1 }
 0x177   :  { %v607_v61 = vadd.f32 %v606_v58, %v517_v57  ;;  %v1503_v10 = vsel %vm1439_vm6, %v1407_v60, %v1471_v5 }
 0x178   :  { %v1334_v63 = vpop.f32.mrf.mxu3 }
 0x179   :  { %v940_v2 = vmul.f32 %v883_v59, %v607_v61  ;;  %v1335_v3 = vadd.f32 %v1334_v63, %v2333_v1  ;;  %v2357_v1 = vpop.f32.mrf.mxu2 }
 0x17a   :  { %1254 = vmatmul.bf16.gmra.mxu2 %v1844_v16 }
 0x17b   :  { %v1408_v51 = vadd.f32 %v2327_v41, %v1335_v3  ;;  %v959_v6 = vpack.c.bf16 %v940_v2, %v939_v0 }
 0x17d   :  { %vm1440_vm7 = vcmp.gt.f32.partialorder %v1408_v51, 0.0  ;;  %v1472_v7 = vmul.f32 0.2, %v1408_v51  ;;  %1376 = vmatmul.bf16.gmra.mxu3 %v959_v6  ;;  %v520_v8 = vpop.f32.mrf.mxu0 }
 0x17e   :  { %v609_v9 = vpop.f32.mrf.mxu1 }
 0x17f   :  { %v1504_v11 = vsel %vm1440_vm7, %v1408_v51, %v1472_v7  ;;  %v610_v17 = vadd.f32 %v609_v9, %v520_v8  ;;  %v913_v51 = vpop.permute.xlu1 %912  ;;  %v908_v8 = vpop.permute.xlu0 %907 }
 0x180   :  { %v1871_v13 = vpack.c.bf16 %v1504_v11, %v1503_v10  ;;  %v1337_v14 = vpop.f32.mrf.mxu3 }
 0x181   :  { %v1338_v15 = vadd.f32 %v1337_v14, %v2336_v12  ;;  %v941_v26 = vmul.f32 %v888_v20, %v610_v17  ;;  %v1215_v33 = vpop.f32.mrf.mxu2 }
 0x182   :  { %1935 = vst [vmem:[#allocation9 + $0x18] sm:$0xff] %v1871_v13  }
 0x183   :  { %v1409_v21 = vadd.f32 %v2327_v41, %v1338_v15 }
 0x185   :  { %v522_v18 = vpop.f32.mrf.mxu0  ;;  %v1473_v29 = vmul.f32 0.2, %v1409_v21  ;;  %vm1441_vm8 = vcmp.gt.f32.partialorder %v1409_v21, 0.0 }
 0x186   :  { %v611_v19 = vpop.f32.mrf.mxu1 }
 0x187   :  { %v612_v22 = vadd.f32 %v611_v19, %v522_v18  ;;  %v1505_v36 = vsel %vm1441_vm8, %v1409_v21, %v1473_v29 }
 0x188   :  { %v1339_v25 = vpop.f32.mrf.mxu3 }
 0x189   :  { %v942_v28 = vmul.f32 %v893_v23, %v612_v22  ;;  %v1340_v24 = vadd.f32 %v1339_v25, %v2340_v27  ;;  %v1217_v50 = vpop.f32.mrf.mxu2 }
 0x18b   :  { %v1410_v12 = vadd.f32 %v2327_v41, %v1340_v24  ;;  %v960_v30 = vpack.c.bf16 %v942_v28, %v941_v26 }
 0x18d   :  { %vm1442_vm9 = vcmp.gt.f32.partialorder %v1410_v12, 0.0  ;;  %v1474_v31 = vmul.f32 0.2, %v1410_v12  ;;  %1381 = vmatmul.bf16.gmra.mxu3 %v960_v30  ;;  %v525_v34 = vpop.f32.mrf.mxu0 }
 0x18e   :  { %v614_v35 = vpop.f32.mrf.mxu1 }
 0x18f   :  { %v1506_v37 = vsel %vm1442_vm9, %v1410_v12, %v1474_v31  ;;  %v615_v44 = vadd.f32 %v614_v35, %v525_v34 }
 0x190   :  { %v1876_v40 = vpack.c.bf16 %v1506_v37, %v1505_v36  ;;  %v1342_v42 = vpop.f32.mrf.mxu3 }
 0x191   :  { %v1343_v43 = vadd.f32 %v1342_v42, %v2344_v38  ;;  %v943_v52 = vmul.f32 %v898_v45, %v615_v44  ;;  %v1220_v0 = vpop.f32.mrf.mxu2 }
 0x192   :  { %1936 = vst [vmem:[#allocation9 + $0x20] sm:$0xff] %v1876_v40  }
 0x193   :  { %v1411_v47 = vadd.f32 %v2327_v41, %v1343_v43 }
 0x195   :  { %v527_v27 = vpop.f32.mrf.mxu0  ;;  %v1475_v39 = vmul.f32 0.2, %v1411_v47  ;;  %vm1443_vm10 = vcmp.gt.f32.partialorder %v1411_v47, 0.0 }
 0x196   :  { %v616_v32 = vpop.f32.mrf.mxu1 }
 0x197   :  { %v617_v48 = vadd.f32 %v616_v32, %v527_v27  ;;  %v1507_v60 = vsel %vm1443_vm10, %v1411_v47, %v1475_v39 }
 0x198   :  { %v1344_v49 = vpop.f32.mrf.mxu3 }
 0x199   :  { %v944_v53 = vmul.f32 %v903_v46, %v617_v48  ;;  %v1345_v55 = vadd.f32 %v1344_v49, %v2348_v54  ;;  %v1222_v17 = vpop.f32.mrf.mxu2 }
 0x19b   :  { %v1412_v56 = vadd.f32 %v2327_v41, %v1345_v55  ;;  %v961_v57 = vpack.c.bf16 %v944_v53, %v943_v52 }
 0x19d   :  { %vm1444_vm11 = vcmp.gt.f32.partialorder %v1412_v56, 0.0  ;;  %v1476_v38 = vmul.f32 0.2, %v1412_v56  ;;  %1386 = vmatmul.bf16.gmra.mxu3 %v961_v57  ;;  %v530_v58 = vpop.f32.mrf.mxu0 }
 0x19e   :  { %v619_v59 = vpop.f32.mrf.mxu1 }
 0x19f   :  { %v1508_v61 = vsel %vm1444_vm11, %v1412_v56, %v1476_v38  ;;  %v620_v3 = vadd.f32 %v619_v59, %v530_v58 }
 0x1a0   :  { %v1881_v62 = vpack.c.bf16 %v1508_v61, %v1507_v60  ;;  %v1347_v63 = vpop.f32.mrf.mxu3 }
 0x1a1   :  { %v1348_v2 = vadd.f32 %v1347_v63, %v2353_v4  ;;  %v945_v10 = vmul.f32 %v908_v8, %v620_v3  ;;  %v1225_v23 = vpop.f32.mrf.mxu2 }
 0x1a2   :  { %1937 = vst [vmem:[#allocation9 + $0x28] sm:$0xff] %v1881_v62  }
 0x1a3   :  { %v1413_v6 = vadd.f32 %v2327_v41, %v1348_v2 }
 0x1a5   :  { %v532_v54 = vpop.f32.mrf.mxu0  ;;  %v1477_v14 = vmul.f32 0.2, %v1413_v6  ;;  %vm1445_vm12 = vcmp.gt.f32.partialorder %v1413_v6, 0.0 }
 0x1a6   :  { %v621_v5 = vpop.f32.mrf.mxu1 }
 0x1a7   :  { %v622_v7 = vadd.f32 %v621_v5, %v532_v54  ;;  %v1509_v18 = vsel %vm1445_vm12, %v1413_v6, %v1477_v14 }
 0x1a8   :  { %v1349_v9 = vpop.f32.mrf.mxu3 }
 0x1a9   :  { %v946_v11 = vmul.f32 %v913_v51, %v622_v7  ;;  %v1350_v13 = vadd.f32 %v1349_v9, %v2357_v1  ;;  %v1227_v35 = vpop.f32.mrf.mxu2 }
 0x1ab   :  { %v1414_v15 = vadd.f32 %v2327_v41, %v1350_v13  ;;  %v962_v16 = vpack.c.bf16 %v946_v11, %v945_v10 }
 0x1ad   :  { %vm1446_vm13 = vcmp.gt.f32.partialorder %v1414_v15, 0.0  ;;  %v1478_v4 = vmul.f32 0.2, %v1414_v15  ;;  %1391 = vmatmul.bf16.gmra.mxu3 %v962_v16 }
 0x1af   :  { %v1510_v19 = vsel %vm1446_vm13, %v1414_v15, %v1478_v4 }
 0x1b0   :  { %v1886_v20 = vpack.c.bf16 %v1510_v19, %v1509_v18  ;;  %v1352_v21 = vpop.f32.mrf.mxu3 }
 0x1b1   :  { %v1353_v22 = vadd.f32 %v1352_v21, %v1215_v33  ;;  %v1230_v42 = vpop.f32.mrf.mxu2 }
 0x1b2   :  { %1938 = vst [vmem:[#allocation9 + $0x30] sm:$0xff] %v1886_v20  }
 0x1b3   :  { %v1415_v25 = vadd.f32 %v2327_v41, %v1353_v22 }
 0x1b5   :  { %v1479_v28 = vmul.f32 0.2, %v1415_v25  ;;  %vm1447_vm14 = vcmp.gt.f32.partialorder %v1415_v25, 0.0 }
 0x1b7   :  { %v1511_v12 = vsel %vm1447_vm14, %v1415_v25, %v1479_v28 }
 0x1b8   :  { %v1354_v26 = vpop.f32.mrf.mxu3 }
 0x1b9   :  { %v1355_v1 = vadd.f32 %v1354_v26, %v1217_v50  ;;  %v1232_v49 = vpop.f32.mrf.mxu2 }
 0x1bb   :  { %v1416_v24 = vadd.f32 %v2327_v41, %v1355_v1 }
 0x1bd   :  { %vm1448_vm15 = vcmp.gt.f32.partialorder %v1416_v24, 0.0  ;;  %v1480_v29 = vmul.f32 0.2, %v1416_v24 }
 0x1bf   :  { %v1512_v30 = vsel %vm1448_vm15, %v1416_v24, %v1480_v29 }
 0x1c0   :  { %v1891_v31 = vpack.c.bf16 %v1512_v30, %v1511_v12  ;;  %v1357_v34 = vpop.f32.mrf.mxu3 }
 0x1c1   :  { %v1358_v36 = vadd.f32 %v1357_v34, %v1220_v0  ;;  %v1235_v57 = vpop.f32.mrf.mxu2 }
 0x1c2   :  { %1939 = vst [vmem:[#allocation9 + $0x38] sm:$0xff] %v1891_v31  }
 0x1c3   :  { %v1417_v33 = vadd.f32 %v2327_v41, %v1358_v36 }
 0x1c5   :  { %v1481_v43 = vmul.f32 0.2, %v1417_v33  ;;  %vm1449_vm0 = vcmp.gt.f32.partialorder %v1417_v33, 0.0 }
 0x1c7   :  { %v1513_v32 = vsel %vm1449_vm0, %v1417_v33, %v1481_v43 }
 0x1c8   :  { %v1359_v37 = vpop.f32.mrf.mxu3 }
 0x1c9   :  { %v1360_v40 = vadd.f32 %v1359_v37, %v1222_v17  ;;  %v1237_v0 = vpop.f32.mrf.mxu2 }
 0x1cb   :  { %v1418_v44 = vadd.f32 %v2327_v41, %v1360_v40 }
 0x1cd   :  { %vm1450_vm1 = vcmp.gt.f32.partialorder %v1418_v44, 0.0  ;;  %v1482_v27 = vmul.f32 0.2, %v1418_v44 }
 0x1cf   :  { %v1514_v45 = vsel %vm1450_vm1, %v1418_v44, %v1482_v27 }
 0x1d0   :  { %v1896_v46 = vpack.c.bf16 %v1514_v45, %v1513_v32  ;;  %v1362_v47 = vpop.f32.mrf.mxu3 }
 0x1d1   :  { %v1363_v48 = vadd.f32 %v1362_v47, %v1225_v23  ;;  %v1240_v9 = vpop.f32.mrf.mxu2 }
 0x1d2   :  { %1940 = vst [vmem:[#allocation9 + $0x40] sm:$0xff] %v1896_v46  }
 0x1d3   :  { %v1419_v50 = vadd.f32 %v2327_v41, %v1363_v48 }
 0x1d5   :  { %v1483_v55 = vmul.f32 0.2, %v1419_v50  ;;  %vm1451_vm2 = vcmp.gt.f32.partialorder %v1419_v50, 0.0 }
 0x1d7   :  { %v1515_v38 = vsel %vm1451_vm2, %v1419_v50, %v1483_v55 }
 0x1d8   :  { %v1364_v52 = vpop.f32.mrf.mxu3 }
 0x1d9   :  { %v1365_v53 = vadd.f32 %v1364_v52, %v1227_v35  ;;  %v1242_v17 = vpop.f32.mrf.mxu2 }
 0x1db   :  { %v1420_v39 = vadd.f32 %v2327_v41, %v1365_v53 }
 0x1dd   :  { %vm1452_vm3 = vcmp.gt.f32.partialorder %v1420_v39, 0.0  ;;  %v1484_v56 = vmul.f32 0.2, %v1420_v39 }
 0x1df   :  { %v1516_v58 = vsel %vm1452_vm3, %v1420_v39, %v1484_v56 }
 0x1e0   :  { %v1901_v59 = vpack.c.bf16 %v1516_v58, %v1515_v38  ;;  %v1367_v60 = vpop.f32.mrf.mxu3 }
 0x1e1   :  { %v1368_v61 = vadd.f32 %v1367_v60, %v1230_v42  ;;  %v1245_v23 = vpop.f32.mrf.mxu2 }
 0x1e2   :  { %1941 = vst [vmem:[#allocation9 + $0x48] sm:$0xff] %v1901_v59  }
 0x1e3   :  { %v1421_v62 = vadd.f32 %v2327_v41, %v1368_v61 }
 0x1e5   :  { %v1485_v3 = vmul.f32 0.2, %v1421_v62  ;;  %vm1453_vm4 = vcmp.gt.f32.partialorder %v1421_v62, 0.0 }
 0x1e7   :  { %v1517_v51 = vsel %vm1453_vm4, %v1421_v62, %v1485_v3 }
 0x1e8   :  { %v1369_v63 = vpop.f32.mrf.mxu3 }
 0x1e9   :  { %v1370_v2 = vadd.f32 %v1369_v63, %v1232_v49  ;;  %v1247_v34 = vpop.f32.mrf.mxu2 }
 0x1eb   :  { %v1422_v54 = vadd.f32 %v2327_v41, %v1370_v2 }
 0x1ed   :  { %vm1454_vm5 = vcmp.gt.f32.partialorder %v1422_v54, 0.0  ;;  %v1486_v5 = vmul.f32 0.2, %v1422_v54 }
 0x1ef   :  { %v1518_v6 = vsel %vm1454_vm5, %v1422_v54, %v1486_v5 }
 0x1f0   :  { %v1906_v7 = vpack.c.bf16 %v1518_v6, %v1517_v51  ;;  %v1372_v8 = vpop.f32.mrf.mxu3 }
 0x1f1   :  { %v1373_v10 = vadd.f32 %v1372_v8, %v1235_v57  ;;  %v1250_v42 = vpop.f32.mrf.mxu2 }
 0x1f2   :  { %1942 = vst [vmem:[#allocation9 + $0x50] sm:$0xff] %v1906_v7  }
 0x1f3   :  { %v1423_v11 = vadd.f32 %v2327_v41, %v1373_v10 }
 0x1f5   :  { %v1487_v15 = vmul.f32 0.2, %v1423_v11  ;;  %vm1455_vm6 = vcmp.gt.f32.partialorder %v1423_v11, 0.0 }
 0x1f7   :  { %v1519_v18 = vsel %vm1455_vm6, %v1423_v11, %v1487_v15 }
 0x1f8   :  { %v1374_v13 = vpop.f32.mrf.mxu3 }
 0x1f9   :  { %v1375_v14 = vadd.f32 %v1374_v13, %v1237_v0  ;;  %v1252_v49 = vpop.f32.mrf.mxu2 }
 0x1fb   :  { %v1424_v16 = vadd.f32 %v2327_v41, %v1375_v14 }
 0x1fd   :  { %vm1456_vm7 = vcmp.gt.f32.partialorder %v1424_v16, 0.0  ;;  %v1488_v4 = vmul.f32 0.2, %v1424_v16 }
 0x1ff   :  { %v1520_v19 = vsel %vm1456_vm7, %v1424_v16, %v1488_v4 }
 0x200   :  { %v1911_v20 = vpack.c.bf16 %v1520_v19, %v1519_v18  ;;  %v1377_v21 = vpop.f32.mrf.mxu3 }
 0x201   :  { %v1378_v22 = vadd.f32 %v1377_v21, %v1240_v9  ;;  %v1255_v57 = vpop.f32.mrf.mxu2 }
 0x202   :  { %1943 = vst [vmem:[#allocation9 + $0x58] sm:$0xff] %v1911_v20  }
 0x203   :  { %v1425_v25 = vadd.f32 %v2327_v41, %v1378_v22 }
 0x205   :  { %v1489_v28 = vmul.f32 0.2, %v1425_v25  ;;  %vm1457_vm8 = vcmp.gt.f32.partialorder %v1425_v25, 0.0 }
 0x207   :  { %v1521_v12 = vsel %vm1457_vm8, %v1425_v25, %v1489_v28 }
 0x208   :  { %v1379_v26 = vpop.f32.mrf.mxu3 }
 0x209   :  { %v1380_v1 = vadd.f32 %v1379_v26, %v1242_v17  ;;  %v1257_v63 = vpop.f32.mrf.mxu2 }
 0x20b   :  { %v1426_v24 = vadd.f32 %v2327_v41, %v1380_v1 }
 0x20d   :  { %vm1458_vm9 = vcmp.gt.f32.partialorder %v1426_v24, 0.0  ;;  %v1490_v29 = vmul.f32 0.2, %v1426_v24 }
 0x20f   :  { %v1522_v30 = vsel %vm1458_vm9, %v1426_v24, %v1490_v29 }
 0x210   :  { %v1916_v31 = vpack.c.bf16 %v1522_v30, %v1521_v12  ;;  %v1382_v35 = vpop.f32.mrf.mxu3 }
 0x211   :  { %v1383_v36 = vadd.f32 %v1382_v35, %v1245_v23 }
 0x212   :  { %1944 = vst [vmem:[#allocation9 + $0x60] sm:$0xff] %v1916_v31  }
 0x213   :  { %v1427_v33 = vadd.f32 %v2327_v41, %v1383_v36 }
 0x215   :  { %v1491_v43 = vmul.f32 0.2, %v1427_v33  ;;  %vm1459_vm10 = vcmp.gt.f32.partialorder %v1427_v33, 0.0 }
 0x217   :  { %v1523_v32 = vsel %vm1459_vm10, %v1427_v33, %v1491_v43 }
 0x218   :  { %v1384_v37 = vpop.f32.mrf.mxu3 }
 0x219   :  { %v1385_v40 = vadd.f32 %v1384_v37, %v1247_v34 }
 0x21b   :  { %v1428_v44 = vadd.f32 %v2327_v41, %v1385_v40 }
 0x21d   :  { %vm1460_vm11 = vcmp.gt.f32.partialorder %v1428_v44, 0.0  ;;  %v1492_v27 = vmul.f32 0.2, %v1428_v44 }
 0x21f   :  { %v1524_v45 = vsel %vm1460_vm11, %v1428_v44, %v1492_v27 }
 0x220   :  { %v1921_v46 = vpack.c.bf16 %v1524_v45, %v1523_v32  ;;  %v1387_v47 = vpop.f32.mrf.mxu3 }
 0x221   :  { %v1388_v48 = vadd.f32 %v1387_v47, %v1250_v42 }
 0x222   :  { %1945 = vst [vmem:[#allocation9 + $0x68] sm:$0xff] %v1921_v46  }
 0x223   :  { %v1429_v50 = vadd.f32 %v2327_v41, %v1388_v48 }
 0x225   :  { %v1493_v55 = vmul.f32 0.2, %v1429_v50  ;;  %vm1461_vm12 = vcmp.gt.f32.partialorder %v1429_v50, 0.0 }
 0x227   :  { %v1525_v38 = vsel %vm1461_vm12, %v1429_v50, %v1493_v55 }
 0x228   :  { %v1389_v52 = vpop.f32.mrf.mxu3 }
 0x229   :  { %v1390_v53 = vadd.f32 %v1389_v52, %v1252_v49 }
 0x22b   :  { %v1430_v39 = vadd.f32 %v2327_v41, %v1390_v53 }
 0x22d   :  { %vm1462_vm13 = vcmp.gt.f32.partialorder %v1430_v39, 0.0  ;;  %v1494_v56 = vmul.f32 0.2, %v1430_v39 }
 0x22f   :  { %v1526_v58 = vsel %vm1462_vm13, %v1430_v39, %v1494_v56 }
 0x230   :  { %v1926_v59 = vpack.c.bf16 %v1526_v58, %v1525_v38  ;;  %v1392_v60 = vpop.f32.mrf.mxu3 }
 0x231   :  { %v1393_v61 = vadd.f32 %v1392_v60, %v1255_v57 }
 0x232   :  { %1946 = vst [vmem:[#allocation9 + $0x70] sm:$0xff] %v1926_v59  }
 0x233   :  { %v1431_v62 = vadd.f32 %v2327_v41, %v1393_v61 }
 0x235   :  { %v1495_v3 = vmul.f32 0.2, %v1431_v62  ;;  %vm1463_vm14 = vcmp.gt.f32.partialorder %v1431_v62, 0.0 }
 0x237   :  { %v1527_v51 = vsel %vm1463_vm14, %v1431_v62, %v1495_v3 }
 0x238   :  { %v1394_v0 = vpop.f32.mrf.mxu3 }
 0x239   :  { %v1395_v2 = vadd.f32 %v1394_v0, %v1257_v63 }
 0x23b   :  { %v1432_v54 = vadd.f32 %v2327_v41, %v1395_v2 }
 0x23d   :  { %vm1464_vm15 = vcmp.gt.f32.partialorder %v1432_v54, 0.0  ;;  %v1496_v5 = vmul.f32 0.2, %v1432_v54 }
 0x23f   :  { %v1528_v6 = vsel %vm1464_vm15, %v1432_v54, %v1496_v5 }
 0x240   :  { %v1931_v7 = vpack.c.bf16 %v1528_v6, %v1527_v51 }
 0x242   :  { %1947 = vst [vmem:[#allocation9 + $0x78] sm:$0xff] %v1931_v7  }
 0x243   :  { %1605 = dma.vmem_to_hbm [thread:$0]  %s1598_s20, 2048, %s1600_s23, [#allocation5], %s2062_s9, %s2062_s9, %s2063_s10  }
 0x244   :  { %2059 = dma.done.wait [#allocation5], 2048  }
 0x245   :  { %2060 = vsyncadd [#allocation5], 4294965248 }
 0x246   :  { %1610 = vsyncpa [#allocation4], 1 }
 0x247   :  { %1611 = vsyncpa [#allocation7], 1 }
 0x248   :  { %1612 = vsyncpa [#allocation5], 1 }

</bundles_post_ra>
